<compile_context>
chip_gen: v6e
topology: v6e:2x2x1
jax: 0.10.0
libtpu: 0.0.40
codegen_flags: <defaults>
</compile_context>

<pallas_src>
import functools

import jax
import jax.numpy as jnp
from jax import lax
from jax.experimental import pallas as pl
from jax.experimental.pallas import tpu as pltpu

BN_EPS = 1e-5
C1, C2, FC_OUT = 8, 4, 16


def _round_up(x, m):
    return ((x + m - 1) // m) * m


def _layout(h, w):
    hh, wh = h // 2, w // 2
    s1c = wh + 1                          # lane stride of the phase-flat grids
    flat1 = (hh + 1) * s1c                # conv1 per-phase lanes (valid hh*wh + ring)
    l1 = flat1 + s1c + 1                  # + head-room for the largest tap offset
    flat_o1 = (hh - 1) * s1c + wh         # valid extent of the conv2/FC flat layout
    flat_op = _round_up(flat_o1, 128)     # lane-dense padded extent (aligned MXU K)
    base = s1c + 1                        # pooled-slab offset inside the pool buffer
    lbuf = 2 * base + flat_op             # pool buffer lane width
    return hh, wh, s1c, flat1, l1, flat_o1, flat_op, base, lbuf


# ------------------------------ fused kernel ------------------------------- #

def _fused_convnet_kernel(nb, hh, wh, flat_op,
                          xph_ref, mask1_ref, tmask_ref, wf_ref, bfc_ref,
                          w1_ref, w2_ref, bn_ref,
                          o_ref, pool_ref):
    """Whole ConvNet forward.

    xph_ref  : [4, nb, l1]           f32  phase-split, flattened, zero-padded input
    mask1_ref: [1, flat1]            f32  conv1 BN validity mask
    tmask_ref: [9, 1, flat_op]       f32  conv2 per-tap validity masks
    wf_ref   : [C2, flat_op, 16]     bf16 FC weight, pre-scattered to flat layout
    bfc_ref  : [1, 16]               f32  FC bias
    w1_ref   : [72]   f32 SMEM            conv1 weights, index c*9 + ky*3 + kx
    w2_ref   : [288]  f32 SMEM            conv2 weights, index (d*8+c)*9 + ky*3 + kx
    bn_ref   : [24]   f32 SMEM            gamma1(8) beta1(8) gamma2(4) beta2(4)
    o_ref    : [nb, 16]              f32  output
    pool_ref : [C1, nb, lbuf]        f32  scratch: pooled conv1 acts (flat layout)
    """
    s1c = wh + 1
    flat1 = (hh + 1) * s1c
    base = s1c + 1
    lbuf = 2 * base + flat_op
    tail = lbuf - base - flat1
    cnt1 = float(nb * 4 * hh * wh)
    cnt2 = float(nb * hh * wh)

    mask1 = mask1_ref[...]                                    # [1, flat1]

    # 16 distinct conv1 source slices, hoisted once and reused by all 8 channels,
    # 4 output phases and 9 taps (implicit im2col via static lane shifts).
    src1 = {}
    for ry in range(4):
        for rx in range(4):
            p = (ry & 1) * 2 + (rx & 1)
            off = (ry >> 1) * s1c + (rx >> 1)
            src1[(ry, rx)] = xph_ref[p, :, off:off + flat1]   # [nb, flat1]

    zhead = jnp.zeros((nb, base), jnp.float32)
    ztail = jnp.zeros((nb, tail), jnp.float32) if tail > 0 else None

    # -------------- conv1 + BN(batch stats) + ReLU + 2x2 max-pool -------------- #
    def conv1_body(c, carry):
        wb = c * 9
        ys = []
        for hy in range(2):                  # output phase = (row parity, col parity)
            for wx in range(2):
                acc = jnp.zeros((nb, flat1), jnp.float32)
                for ky in range(3):
                    for kx in range(3):
                        acc = acc + w1_ref[wb + ky * 3 + kx] * src1[(hy + ky, wx + kx)]
                ys.append(acc)
        # One-pass BN stats (E[x^2]-mu^2; fine at test tolerance, cancellation-prone
        # for |mu| >> sigma — switch to shifted two-pass for real data).
        s_sum = (ys[0] + ys[1] + ys[2] + ys[3]) * mask1
        q_sum = (ys[0] * ys[0] + ys[1] * ys[1]
                 + ys[2] * ys[2] + ys[3] * ys[3]) * mask1
        mu = jnp.sum(s_sum, axis=(0, 1), keepdims=True) / cnt1
        var = jnp.maximum(
            jnp.sum(q_sum, axis=(0, 1), keepdims=True) / cnt1 - mu * mu, 0.0)
        scale = bn_ref[c] * lax.rsqrt(var + BN_EPS)
        shift = bn_ref[C1 + c] - mu * scale
        r0 = jnp.maximum(ys[0] * scale + shift, 0.0)
        r1 = jnp.maximum(ys[1] * scale + shift, 0.0)
        r2 = jnp.maximum(ys[2] * scale + shift, 0.0)
        r3 = jnp.maximum(ys[3] * scale + shift, 0.0)
        # max-pool(2x2) == elementwise max over the 4 output phases
        pooled = jnp.maximum(jnp.maximum(r0, r1), jnp.maximum(r2, r3))
        parts = [zhead, pooled] + ([ztail] if ztail is not None else [])
        pool_ref[c] = jnp.concatenate(parts, axis=1)    # ONE full-slab store/channel
        return carry

    lax.fori_loop(0, C1, conv1_body, 0)

    # -------- conv2 + BN(batch stats) + ReLU, with the FC folded straight in ------ #
    tmask = [tmask_ref[t] for t in range(9)]            # hoisted: [1, flat_op] each

    def conv2_body(c, accs):
        row = pool_ref[c]                               # [nb, lbuf]
        wb = c * 9
        new = list(accs)
        for ky in range(3):
            for kx in range(3):
                t = ky * 3 + kx
                start = base + (ky - 1) * s1c + (kx - 1)
                # one slice + one mask-mul per (c, tap); reused for all 4 outputs
                srcm = row[:, start:start + flat_op] * tmask[t]
                for d in range(C2):                     # d inner: 4 live accumulators
                    new[d] = new[d] + w2_ref[d * C1 * 9 + wb + t] * srcm
        return tuple(new)

    acc0 = jnp.zeros((nb, flat_op), jnp.float32)
    accs = lax.fori_loop(0, C1, conv2_body, (acc0, acc0, acc0, acc0))

    o_acc = jnp.zeros((nb, FC_OUT), jnp.float32)
    for d in range(C2):
        acc = accs[d]                 # ring / pad lanes are exactly 0 (tap masks)
        mu = jnp.sum(acc, axis=(0, 1), keepdims=True) / cnt2
        var = jnp.maximum(
            jnp.sum(acc * acc, axis=(0, 1), keepdims=True) / cnt2 - mu * mu, 0.0)
        scale = bn_ref[2 * C1 + d] * lax.rsqrt(var + BN_EPS)
        shift = bn_ref[2 * C1 + C2 + d] - mu * scale
        a2 = jnp.maximum(acc * scale + shift, 0.0)
        # FC fold: wf_ref[d] has zero rows on ring/pad lanes, so no feat scatter.
        o_acc = o_acc + jnp.dot(a2.astype(jnp.bfloat16), wf_ref[d],
                                preferred_element_type=jnp.float32)
    o_ref[...] = o_acc + bfc_ref[...]


# ------------------------------- JAX wrapper -------------------------------- #

def convnet_forward(x_nchw, kp):
    """x_nchw: [N, 1, H, W] float32 (PyTorch layout); kp: prepare_params() output."""
    n, cin, h, w = x_nchw.shape
    assert cin == 1 and h % 2 == 0 and w % 2 == 0
    hh, wh, s1c, flat1, l1, flat_o1, flat_op, base, lbuf = _layout(h, w)

    # Phase-split (even/odd rows & cols) of the zero-padded input, flattened so the
    # kernel's implicit im2col is 16 shared static lane-shifted slices.
    x = x_nchw[:, 0]
    xpad = jnp.pad(x, ((0, 0), (1, 1), (1, 1)))
    phases = [xpad[:, py::2, px::2].reshape(n, flat1)
              for py in range(2) for px in range(2)]
    xph = jnp.pad(jnp.stack(phases, axis=0), ((0, 0), (0, 0), (0, l1 - flat1)))

    # conv1 BN validity mask (exclude garbage ring lanes of the phase-flat layout).
    f1 = jnp.arange(flat1)
    mask1 = (((f1 // s1c) < hh) & ((f1 % s1c) < wh)).astype(jnp.float32)[None, :]

    # conv2 per-tap validity masks over the flat output lanes: out lane valid AND
    # the tap's source position inside the pooled hh x wh grid.
    L = jnp.arange(flat_op)
    li, lj = L // s1c, L % s1c
    out_ok = (li < hh) & (lj < wh)
    tmask = jnp.stack(
        [(out_ok
          & (li + ky - 1 >= 0) & (li + ky - 1 < hh)
          & (lj + kx - 1 >= 0) & (lj + kx - 1 < wh)).astype(jnp.float32)
         for ky in range(3) for kx in range(3)], axis=0)[:, None, :]   # [9,1,flat_op]

    kernel = functools.partial(_fused_convnet_kernel, n, hh, wh, flat_op)
    vmem = pl.BlockSpec(memory_space=pltpu.MemorySpace.VMEM)
    smem = pl.BlockSpec(memory_space=pltpu.MemorySpace.SMEM)
    return pl.pallas_call(
        kernel,
        out_shape=jax.ShapeDtypeStruct((n, FC_OUT), jnp.float32),
        in_specs=[vmem, vmem, vmem, vmem, vmem, smem, smem, smem],
        out_specs=vmem,
        scratch_shapes=[pltpu.VMEM((C1, n, lbuf), jnp.float32)],
        compiler_params=pltpu.CompilerParams(vmem_limit_bytes=32 * 1024 * 1024),
    )(xph, mask1, tmask, kp["wf_flat"], kp["bf"], kp["w1"], kp["w2"], kp["bn"])


def prepare_params(params, h, w):
    """One-time conversion of PyTorch-layout parameters to kernel-ready layout.

    Conv biases b1/b2 are not passed: with train-mode BatchNorm right after each
    conv, a per-channel constant bias is exactly cancelled by the mean subtraction.
    The FC weight is pre-scattered into the strided flat conv2-output lane layout
    (zero rows on ring/pad lanes) so the FC folds into the conv2 epilogue.
    """
    hh, wh, s1c, flat1, l1, flat_o1, flat_op, base, lbuf = _layout(h, w)
    wf = params["wf"].astype(jnp.float32).reshape(FC_OUT, C2, hh, wh)
    wf = jnp.transpose(wf, (1, 2, 3, 0)).reshape(C2, hh * wh, FC_OUT)
    lanes = (jnp.arange(hh)[:, None] * s1c + jnp.arange(wh)[None, :]).reshape(-1)
    wf_flat = jnp.zeros((C2, flat_op, FC_OUT), jnp.float32).at[:, lanes, :].set(wf)
    return {
        "w1": params["w1"].reshape(-1).astype(jnp.float32),        # [72]  c*9+ky*3+kx
        "w2": params["w2"].reshape(-1).astype(jnp.float32),        # [288] (d*8+c)*9+t
        "bn": jnp.concatenate([params["g1"], params["beta1"],
                               params["g2"], params["beta2"]]).astype(jnp.float32),
        "wf_flat": wf_flat.astype(jnp.bfloat16),                   # [C2, flat_op, 16]
        "bf": params["bf"].reshape(1, -1).astype(jnp.float32),     # [1, 16]
    }


def init_params(key, h, w):
    ks = jax.random.split(key, 6)
    fc_in = C2 * (h // 2) * (w // 2)
    return {
        "w1": 0.1 * jax.random.normal(ks[0], (C1, 1, 3, 3), jnp.float32),
        "b1": 0.1 * jax.random.normal(ks[1], (C1,), jnp.float32),
        "g1": jnp.ones((C1,), jnp.float32),
        "beta1": jnp.zeros((C1,), jnp.float32),
        "w2": 0.1 * jax.random.normal(ks[2], (C2, C1, 3, 3), jnp.float32),
        "b2": 0.1 * jax.random.normal(ks[3], (C2,), jnp.float32),
        "g2": jnp.ones((C2,), jnp.float32),
        "beta2": jnp.zeros((C2,), jnp.float32),
        "wf": 0.1 * jax.random.normal(ks[4], (FC_OUT, fc_in), jnp.float32),
        "bf": 0.1 * jax.random.normal(ks[5], (FC_OUT,), jnp.float32),
    }


# --------------------------- pure-JAX reference ----------------------------- #

def _reference_forward(x_nchw, params):
    def bn(y, g, b):
        mu = y.mean(axis=(0, 2, 3), keepdims=True)
        var = ((y - mu) ** 2).mean(axis=(0, 2, 3), keepdims=True)
        return ((y - mu) * lax.rsqrt(var + BN_EPS)
                * g.reshape(1, -1, 1, 1) + b.reshape(1, -1, 1, 1))

    dn = ("NCHW", "OIHW", "NCHW")
    y = lax.conv_general_dilated(x_nchw, params["w1"], (1, 1), "SAME",
                                 dimension_numbers=dn)
    y = y + params["b1"].reshape(1, -1, 1, 1)
    y = jnp.maximum(bn(y, params["g1"], params["beta1"]), 0.0)
    n, c, h, w = y.shape
    y = y.reshape(n, c, h // 2, 2, w // 2, 2).max(axis=(3, 5))
    y = lax.conv_general_dilated(y, params["w2"], (1, 1), "SAME",
                                 dimension_numbers=dn)
    y = y + params["b2"].reshape(1, -1, 1, 1)
    y = jnp.maximum(bn(y, params["g2"], params["beta2"]), 0.0)
    feat = y.reshape(n, -1)
    return feat @ params["wf"].T + params["bf"]


if __name__ == "__main__":
    key = jax.random.PRNGKey(0)
    k_x, k_p = jax.random.split(key)

    H, W, N = 16, 16, 2
    x = jax.random.normal(k_x, (N, 1, H, W), jnp.float32)      # NCHW, like PyTorch
    params = init_params(k_p, H, W)
    kparams = prepare_params(params, H, W)

    out = jax.jit(convnet_forward)(x, kparams)
    out = jax.block_until_ready(out)
    assert out.shape == (N, FC_OUT), out.shape

    ref = jax.block_until_ready(jax.jit(_reference_forward)(x, params))
    assert jnp.allclose(out, ref, atol=5e-2, rtol=5e-2), (
        float(jnp.max(jnp.abs(out - ref))))
    print("KERNEL_OK")
</pallas_src>

<mosaic_0001>
module attributes {stable_mosaic.version = 11 : i64} {
  func.func @_fused_convnet_kernel(%arg0: memref<4x2x91xf32, #tpu.memory_space<vmem>>, %arg1: memref<1x81xf32, #tpu.memory_space<vmem>>, %arg2: memref<9x1x128xf32, #tpu.memory_space<vmem>>, %arg3: memref<4x128x16xbf16, #tpu.memory_space<vmem>>, %arg4: memref<1x16xf32, #tpu.memory_space<vmem>>, %arg5: memref<72xf32, #tpu.memory_space<smem>>, %arg6: memref<288xf32, #tpu.memory_space<smem>>, %arg7: memref<24xf32, #tpu.memory_space<smem>>, %arg8: memref<2x16xf32, #tpu.memory_space<vmem>>, %arg9: memref<8x2x148xf32, #tpu.memory_space<vmem>>) attributes {dimension_semantics = [], scalar_prefetch = 0 : i64, scratch_operands = 1 : i64, tpu.core_type = #tpu.core_type<tc>} {
    %c0 = arith.constant 0 : index
    %c0_0 = arith.constant 0 : index
    %0 = vector.load %arg1[%c0, %c0_0] : memref<1x81xf32, #tpu.memory_space<vmem>>, vector<1x81xf32>
    %c0_1 = arith.constant 0 : index
    %c0_2 = arith.constant 0 : index
    %c0_3 = arith.constant 0 : index
    %1 = vector.load %arg0[%c0_1, %c0_2, %c0_3] : memref<4x2x91xf32, #tpu.memory_space<vmem>>, vector<1x2x81xf32>
    %2 = vector.shape_cast %1 : vector<1x2x81xf32> to vector<2x81xf32>
    %c1 = arith.constant 1 : index
    %c0_4 = arith.constant 0 : index
    %c0_5 = arith.constant 0 : index
    %3 = vector.load %arg0[%c1, %c0_4, %c0_5] : memref<4x2x91xf32, #tpu.memory_space<vmem>>, vector<1x2x81xf32>
    %4 = vector.shape_cast %3 : vector<1x2x81xf32> to vector<2x81xf32>
    %c0_6 = arith.constant 0 : index
    %c0_7 = arith.constant 0 : index
    %c1_8 = arith.constant 1 : index
    %5 = vector.load %arg0[%c0_6, %c0_7, %c1_8] : memref<4x2x91xf32, #tpu.memory_space<vmem>>, vector<1x2x81xf32>
    %6 = vector.shape_cast %5 : vector<1x2x81xf32> to vector<2x81xf32>
    %c1_9 = arith.constant 1 : index
    %c0_10 = arith.constant 0 : index
    %c1_11 = arith.constant 1 : index
    %7 = vector.load %arg0[%c1_9, %c0_10, %c1_11] : memref<4x2x91xf32, #tpu.memory_space<vmem>>, vector<1x2x81xf32>
    %8 = vector.shape_cast %7 : vector<1x2x81xf32> to vector<2x81xf32>
    %c2 = arith.constant 2 : index
    %c0_12 = arith.constant 0 : index
    %c0_13 = arith.constant 0 : index
    %9 = vector.load %arg0[%c2, %c0_12, %c0_13] : memref<4x2x91xf32, #tpu.memory_space<vmem>>, vector<1x2x81xf32>
    %10 = vector.shape_cast %9 : vector<1x2x81xf32> to vector<2x81xf32>
    %c3 = arith.constant 3 : index
    %c0_14 = arith.constant 0 : index
    %c0_15 = arith.constant 0 : index
    %11 = vector.load %arg0[%c3, %c0_14, %c0_15] : memref<4x2x91xf32, #tpu.memory_space<vmem>>, vector<1x2x81xf32>
    %12 = vector.shape_cast %11 : vector<1x2x81xf32> to vector<2x81xf32>
    %c2_16 = arith.constant 2 : index
    %c0_17 = arith.constant 0 : index
    %c1_18 = arith.constant 1 : index
    %13 = vector.load %arg0[%c2_16, %c0_17, %c1_18] : memref<4x2x91xf32, #tpu.memory_space<vmem>>, vector<1x2x81xf32>
    %14 = vector.shape_cast %13 : vector<1x2x81xf32> to vector<2x81xf32>
    %c3_19 = arith.constant 3 : index
    %c0_20 = arith.constant 0 : index
    %c1_21 = arith.constant 1 : index
    %15 = vector.load %arg0[%c3_19, %c0_20, %c1_21] : memref<4x2x91xf32, #tpu.memory_space<vmem>>, vector<1x2x81xf32>
    %16 = vector.shape_cast %15 : vector<1x2x81xf32> to vector<2x81xf32>
    %c0_22 = arith.constant 0 : index
    %c0_23 = arith.constant 0 : index
    %c9 = arith.constant 9 : index
    %17 = vector.load %arg0[%c0_22, %c0_23, %c9] : memref<4x2x91xf32, #tpu.memory_space<vmem>>, vector<1x2x81xf32>
    %18 = vector.shape_cast %17 : vector<1x2x81xf32> to vector<2x81xf32>
    %c1_24 = arith.constant 1 : index
    %c0_25 = arith.constant 0 : index
    %c9_26 = arith.constant 9 : index
    %19 = vector.load %arg0[%c1_24, %c0_25, %c9_26] : memref<4x2x91xf32, #tpu.memory_space<vmem>>, vector<1x2x81xf32>
    %20 = vector.shape_cast %19 : vector<1x2x81xf32> to vector<2x81xf32>
    %c0_27 = arith.constant 0 : index
    %c0_28 = arith.constant 0 : index
    %c10 = arith.constant 10 : index
    %21 = vector.load %arg0[%c0_27, %c0_28, %c10] : memref<4x2x91xf32, #tpu.memory_space<vmem>>, vector<1x2x81xf32>
    %22 = vector.shape_cast %21 : vector<1x2x81xf32> to vector<2x81xf32>
    %c1_29 = arith.constant 1 : index
    %c0_30 = arith.constant 0 : index
    %c10_31 = arith.constant 10 : index
    %23 = vector.load %arg0[%c1_29, %c0_30, %c10_31] : memref<4x2x91xf32, #tpu.memory_space<vmem>>, vector<1x2x81xf32>
    %24 = vector.shape_cast %23 : vector<1x2x81xf32> to vector<2x81xf32>
    %c2_32 = arith.constant 2 : index
    %c0_33 = arith.constant 0 : index
    %c9_34 = arith.constant 9 : index
    %25 = vector.load %arg0[%c2_32, %c0_33, %c9_34] : memref<4x2x91xf32, #tpu.memory_space<vmem>>, vector<1x2x81xf32>
    %26 = vector.shape_cast %25 : vector<1x2x81xf32> to vector<2x81xf32>
    %c3_35 = arith.constant 3 : index
    %c0_36 = arith.constant 0 : index
    %c9_37 = arith.constant 9 : index
    %27 = vector.load %arg0[%c3_35, %c0_36, %c9_37] : memref<4x2x91xf32, #tpu.memory_space<vmem>>, vector<1x2x81xf32>
    %28 = vector.shape_cast %27 : vector<1x2x81xf32> to vector<2x81xf32>
    %c2_38 = arith.constant 2 : index
    %c0_39 = arith.constant 0 : index
    %c10_40 = arith.constant 10 : index
    %29 = vector.load %arg0[%c2_38, %c0_39, %c10_40] : memref<4x2x91xf32, #tpu.memory_space<vmem>>, vector<1x2x81xf32>
    %30 = vector.shape_cast %29 : vector<1x2x81xf32> to vector<2x81xf32>
    %c3_41 = arith.constant 3 : index
    %c0_42 = arith.constant 0 : index
    %c10_43 = arith.constant 10 : index
    %31 = vector.load %arg0[%c3_41, %c0_42, %c10_43] : memref<4x2x91xf32, #tpu.memory_space<vmem>>, vector<1x2x81xf32>
    %32 = vector.shape_cast %31 : vector<1x2x81xf32> to vector<2x81xf32>
    %cst = arith.constant 0.000000e+00 : f32
    %33 = vector.broadcast %cst : f32 to vector<2x10xf32>
    %cst_44 = arith.constant 0.000000e+00 : f32
    %34 = vector.broadcast %cst_44 : f32 to vector<2x57xf32>
    %c0_i32 = arith.constant 0 : i32
    %c8_i32 = arith.constant 8 : i32
    %35 = arith.addi %c0_i32, %c8_i32 : i32
    %c1_i32 = arith.constant 1 : i32
    scf.for %arg10 = %c0_i32 to %35 step %c1_i32  : i32 {
      %c9_i32 = arith.constant 9 : i32
      %222 = arith.muli %arg10, %c9_i32 : i32
      %cst_122 = arith.constant 0.000000e+00 : f32
      %223 = vector.broadcast %cst_122 : f32 to vector<2x81xf32>
      %c0_i32_123 = arith.constant 0 : i32
      %224 = arith.addi %222, %c0_i32_123 : i32
      %c0_i32_124 = arith.constant 0 : i32
      %225 = arith.addi %224, %c0_i32_124 : i32
      %226 = arith.index_cast %225 : i32 to index
      %227 = memref.load %arg5[%226] : memref<72xf32, #tpu.memory_space<smem>>
      %228 = vector.broadcast %227 : f32 to vector<2x81xf32>
      %229 = arith.mulf %228, %2 : vector<2x81xf32>
      %230 = arith.addf %223, %229 : vector<2x81xf32>
      %c0_i32_125 = arith.constant 0 : i32
      %231 = arith.addi %222, %c0_i32_125 : i32
      %c1_i32_126 = arith.constant 1 : i32
      %232 = arith.addi %231, %c1_i32_126 : i32
      %233 = arith.index_cast %232 : i32 to index
      %234 = memref.load %arg5[%233] : memref<72xf32, #tpu.memory_space<smem>>
      %235 = vector.broadcast %234 : f32 to vector<2x81xf32>
      %236 = arith.mulf %235, %4 : vector<2x81xf32>
      %237 = arith.addf %230, %236 : vector<2x81xf32>
      %c0_i32_127 = arith.constant 0 : i32
      %238 = arith.addi %222, %c0_i32_127 : i32
      %c2_i32 = arith.constant 2 : i32
      %239 = arith.addi %238, %c2_i32 : i32
      %240 = arith.index_cast %239 : i32 to index
      %241 = memref.load %arg5[%240] : memref<72xf32, #tpu.memory_space<smem>>
      %242 = vector.broadcast %241 : f32 to vector<2x81xf32>
      %243 = arith.mulf %242, %6 : vector<2x81xf32>
      %244 = arith.addf %237, %243 : vector<2x81xf32>
      %c3_i32 = arith.constant 3 : i32
      %245 = arith.addi %222, %c3_i32 : i32
      %c0_i32_128 = arith.constant 0 : i32
      %246 = arith.addi %245, %c0_i32_128 : i32
      %247 = arith.index_cast %246 : i32 to index
      %248 = memref.load %arg5[%247] : memref<72xf32, #tpu.memory_space<smem>>
      %249 = vector.broadcast %248 : f32 to vector<2x81xf32>
      %250 = arith.mulf %249, %10 : vector<2x81xf32>
      %251 = arith.addf %244, %250 : vector<2x81xf32>
      %c3_i32_129 = arith.constant 3 : i32
      %252 = arith.addi %222, %c3_i32_129 : i32
      %c1_i32_130 = arith.constant 1 : i32
      %253 = arith.addi %252, %c1_i32_130 : i32
      %254 = arith.index_cast %253 : i32 to index
      %255 = memref.load %arg5[%254] : memref<72xf32, #tpu.memory_space<smem>>
      %256 = vector.broadcast %255 : f32 to vector<2x81xf32>
      %257 = arith.mulf %256, %12 : vector<2x81xf32>
      %258 = arith.addf %251, %257 : vector<2x81xf32>
      %c3_i32_131 = arith.constant 3 : i32
      %259 = arith.addi %222, %c3_i32_131 : i32
      %c2_i32_132 = arith.constant 2 : i32
      %260 = arith.addi %259, %c2_i32_132 : i32
      %261 = arith.index_cast %260 : i32 to index
      %262 = memref.load %arg5[%261] : memref<72xf32, #tpu.memory_space<smem>>
      %263 = vector.broadcast %262 : f32 to vector<2x81xf32>
      %264 = arith.mulf %263, %14 : vector<2x81xf32>
      %265 = arith.addf %258, %264 : vector<2x81xf32>
      %c6_i32 = arith.constant 6 : i32
      %266 = arith.addi %222, %c6_i32 : i32
      %c0_i32_133 = arith.constant 0 : i32
      %267 = arith.addi %266, %c0_i32_133 : i32
      %268 = arith.index_cast %267 : i32 to index
      %269 = memref.load %arg5[%268] : memref<72xf32, #tpu.memory_space<smem>>
      %270 = vector.broadcast %269 : f32 to vector<2x81xf32>
      %271 = arith.mulf %270, %18 : vector<2x81xf32>
      %272 = arith.addf %265, %271 : vector<2x81xf32>
      %c6_i32_134 = arith.constant 6 : i32
      %273 = arith.addi %222, %c6_i32_134 : i32
      %c1_i32_135 = arith.constant 1 : i32
      %274 = arith.addi %273, %c1_i32_135 : i32
      %275 = arith.index_cast %274 : i32 to index
      %276 = memref.load %arg5[%275] : memref<72xf32, #tpu.memory_space<smem>>
      %277 = vector.broadcast %276 : f32 to vector<2x81xf32>
      %278 = arith.mulf %277, %20 : vector<2x81xf32>
      %279 = arith.addf %272, %278 : vector<2x81xf32>
      %c6_i32_136 = arith.constant 6 : i32
      %280 = arith.addi %222, %c6_i32_136 : i32
      %c2_i32_137 = arith.constant 2 : i32
      %281 = arith.addi %280, %c2_i32_137 : i32
      %282 = arith.index_cast %281 : i32 to index
      %283 = memref.load %arg5[%282] : memref<72xf32, #tpu.memory_space<smem>>
      %284 = vector.broadcast %283 : f32 to vector<2x81xf32>
      %285 = arith.mulf %284, %22 : vector<2x81xf32>
      %286 = arith.addf %279, %285 : vector<2x81xf32>
      %cst_138 = arith.constant 0.000000e+00 : f32
      %287 = vector.broadcast %cst_138 : f32 to vector<2x81xf32>
      %c0_i32_139 = arith.constant 0 : i32
      %288 = arith.addi %222, %c0_i32_139 : i32
      %c0_i32_140 = arith.constant 0 : i32
      %289 = arith.addi %288, %c0_i32_140 : i32
      %290 = arith.index_cast %289 : i32 to index
      %291 = memref.load %arg5[%290] : memref<72xf32, #tpu.memory_space<smem>>
      %292 = vector.broadcast %291 : f32 to vector<2x81xf32>
      %293 = arith.mulf %292, %4 : vector<2x81xf32>
      %294 = arith.addf %287, %293 : vector<2x81xf32>
      %c0_i32_141 = arith.constant 0 : i32
      %295 = arith.addi %222, %c0_i32_141 : i32
      %c1_i32_142 = arith.constant 1 : i32
      %296 = arith.addi %295, %c1_i32_142 : i32
      %297 = arith.index_cast %296 : i32 to index
      %298 = memref.load %arg5[%297] : memref<72xf32, #tpu.memory_space<smem>>
      %299 = vector.broadcast %298 : f32 to vector<2x81xf32>
      %300 = arith.mulf %299, %6 : vector<2x81xf32>
      %301 = arith.addf %294, %300 : vector<2x81xf32>
      %c0_i32_143 = arith.constant 0 : i32
      %302 = arith.addi %222, %c0_i32_143 : i32
      %c2_i32_144 = arith.constant 2 : i32
      %303 = arith.addi %302, %c2_i32_144 : i32
      %304 = arith.index_cast %303 : i32 to index
      %305 = memref.load %arg5[%304] : memref<72xf32, #tpu.memory_space<smem>>
      %306 = vector.broadcast %305 : f32 to vector<2x81xf32>
      %307 = arith.mulf %306, %8 : vector<2x81xf32>
      %308 = arith.addf %301, %307 : vector<2x81xf32>
      %c3_i32_145 = arith.constant 3 : i32
      %309 = arith.addi %222, %c3_i32_145 : i32
      %c0_i32_146 = arith.constant 0 : i32
      %310 = arith.addi %309, %c0_i32_146 : i32
      %311 = arith.index_cast %310 : i32 to index
      %312 = memref.load %arg5[%311] : memref<72xf32, #tpu.memory_space<smem>>
      %313 = vector.broadcast %312 : f32 to vector<2x81xf32>
      %314 = arith.mulf %313, %12 : vector<2x81xf32>
      %315 = arith.addf %308, %314 : vector<2x81xf32>
      %c3_i32_147 = arith.constant 3 : i32
      %316 = arith.addi %222, %c3_i32_147 : i32
      %c1_i32_148 = arith.constant 1 : i32
      %317 = arith.addi %316, %c1_i32_148 : i32
      %318 = arith.index_cast %317 : i32 to index
      %319 = memref.load %arg5[%318] : memref<72xf32, #tpu.memory_space<smem>>
      %320 = vector.broadcast %319 : f32 to vector<2x81xf32>
      %321 = arith.mulf %320, %14 : vector<2x81xf32>
      %322 = arith.addf %315, %321 : vector<2x81xf32>
      %c3_i32_149 = arith.constant 3 : i32
      %323 = arith.addi %222, %c3_i32_149 : i32
      %c2_i32_150 = arith.constant 2 : i32
      %324 = arith.addi %323, %c2_i32_150 : i32
      %325 = arith.index_cast %324 : i32 to index
      %326 = memref.load %arg5[%325] : memref<72xf32, #tpu.memory_space<smem>>
      %327 = vector.broadcast %326 : f32 to vector<2x81xf32>
      %328 = arith.mulf %327, %16 : vector<2x81xf32>
      %329 = arith.addf %322, %328 : vector<2x81xf32>
      %c6_i32_151 = arith.constant 6 : i32
      %330 = arith.addi %222, %c6_i32_151 : i32
      %c0_i32_152 = arith.constant 0 : i32
      %331 = arith.addi %330, %c0_i32_152 : i32
      %332 = arith.index_cast %331 : i32 to index
      %333 = memref.load %arg5[%332] : memref<72xf32, #tpu.memory_space<smem>>
      %334 = vector.broadcast %333 : f32 to vector<2x81xf32>
      %335 = arith.mulf %334, %20 : vector<2x81xf32>
      %336 = arith.addf %329, %335 : vector<2x81xf32>
      %c6_i32_153 = arith.constant 6 : i32
      %337 = arith.addi %222, %c6_i32_153 : i32
      %c1_i32_154 = arith.constant 1 : i32
      %338 = arith.addi %337, %c1_i32_154 : i32
      %339 = arith.index_cast %338 : i32 to index
      %340 = memref.load %arg5[%339] : memref<72xf32, #tpu.memory_space<smem>>
      %341 = vector.broadcast %340 : f32 to vector<2x81xf32>
      %342 = arith.mulf %341, %22 : vector<2x81xf32>
      %343 = arith.addf %336, %342 : vector<2x81xf32>
      %c6_i32_155 = arith.constant 6 : i32
      %344 = arith.addi %222, %c6_i32_155 : i32
      %c2_i32_156 = arith.constant 2 : i32
      %345 = arith.addi %344, %c2_i32_156 : i32
      %346 = arith.index_cast %345 : i32 to index
      %347 = memref.load %arg5[%346] : memref<72xf32, #tpu.memory_space<smem>>
      %348 = vector.broadcast %347 : f32 to vector<2x81xf32>
      %349 = arith.mulf %348, %24 : vector<2x81xf32>
      %350 = arith.addf %343, %349 : vector<2x81xf32>
      %cst_157 = arith.constant 0.000000e+00 : f32
      %351 = vector.broadcast %cst_157 : f32 to vector<2x81xf32>
      %c0_i32_158 = arith.constant 0 : i32
      %352 = arith.addi %222, %c0_i32_158 : i32
      %c0_i32_159 = arith.constant 0 : i32
      %353 = arith.addi %352, %c0_i32_159 : i32
      %354 = arith.index_cast %353 : i32 to index
      %355 = memref.load %arg5[%354] : memref<72xf32, #tpu.memory_space<smem>>
      %356 = vector.broadcast %355 : f32 to vector<2x81xf32>
      %357 = arith.mulf %356, %10 : vector<2x81xf32>
      %358 = arith.addf %351, %357 : vector<2x81xf32>
      %c0_i32_160 = arith.constant 0 : i32
      %359 = arith.addi %222, %c0_i32_160 : i32
      %c1_i32_161 = arith.constant 1 : i32
      %360 = arith.addi %359, %c1_i32_161 : i32
      %361 = arith.index_cast %360 : i32 to index
      %362 = memref.load %arg5[%361] : memref<72xf32, #tpu.memory_space<smem>>
      %363 = vector.broadcast %362 : f32 to vector<2x81xf32>
      %364 = arith.mulf %363, %12 : vector<2x81xf32>
      %365 = arith.addf %358, %364 : vector<2x81xf32>
      %c0_i32_162 = arith.constant 0 : i32
      %366 = arith.addi %222, %c0_i32_162 : i32
      %c2_i32_163 = arith.constant 2 : i32
      %367 = arith.addi %366, %c2_i32_163 : i32
      %368 = arith.index_cast %367 : i32 to index
      %369 = memref.load %arg5[%368] : memref<72xf32, #tpu.memory_space<smem>>
      %370 = vector.broadcast %369 : f32 to vector<2x81xf32>
      %371 = arith.mulf %370, %14 : vector<2x81xf32>
      %372 = arith.addf %365, %371 : vector<2x81xf32>
      %c3_i32_164 = arith.constant 3 : i32
      %373 = arith.addi %222, %c3_i32_164 : i32
      %c0_i32_165 = arith.constant 0 : i32
      %374 = arith.addi %373, %c0_i32_165 : i32
      %375 = arith.index_cast %374 : i32 to index
      %376 = memref.load %arg5[%375] : memref<72xf32, #tpu.memory_space<smem>>
      %377 = vector.broadcast %376 : f32 to vector<2x81xf32>
      %378 = arith.mulf %377, %18 : vector<2x81xf32>
      %379 = arith.addf %372, %378 : vector<2x81xf32>
      %c3_i32_166 = arith.constant 3 : i32
      %380 = arith.addi %222, %c3_i32_166 : i32
      %c1_i32_167 = arith.constant 1 : i32
      %381 = arith.addi %380, %c1_i32_167 : i32
      %382 = arith.index_cast %381 : i32 to index
      %383 = memref.load %arg5[%382] : memref<72xf32, #tpu.memory_space<smem>>
      %384 = vector.broadcast %383 : f32 to vector<2x81xf32>
      %385 = arith.mulf %384, %20 : vector<2x81xf32>
      %386 = arith.addf %379, %385 : vector<2x81xf32>
      %c3_i32_168 = arith.constant 3 : i32
      %387 = arith.addi %222, %c3_i32_168 : i32
      %c2_i32_169 = arith.constant 2 : i32
      %388 = arith.addi %387, %c2_i32_169 : i32
      %389 = arith.index_cast %388 : i32 to index
      %390 = memref.load %arg5[%389] : memref<72xf32, #tpu.memory_space<smem>>
      %391 = vector.broadcast %390 : f32 to vector<2x81xf32>
      %392 = arith.mulf %391, %22 : vector<2x81xf32>
      %393 = arith.addf %386, %392 : vector<2x81xf32>
      %c6_i32_170 = arith.constant 6 : i32
      %394 = arith.addi %222, %c6_i32_170 : i32
      %c0_i32_171 = arith.constant 0 : i32
      %395 = arith.addi %394, %c0_i32_171 : i32
      %396 = arith.index_cast %395 : i32 to index
      %397 = memref.load %arg5[%396] : memref<72xf32, #tpu.memory_space<smem>>
      %398 = vector.broadcast %397 : f32 to vector<2x81xf32>
      %399 = arith.mulf %398, %26 : vector<2x81xf32>
      %400 = arith.addf %393, %399 : vector<2x81xf32>
      %c6_i32_172 = arith.constant 6 : i32
      %401 = arith.addi %222, %c6_i32_172 : i32
      %c1_i32_173 = arith.constant 1 : i32
      %402 = arith.addi %401, %c1_i32_173 : i32
      %403 = arith.index_cast %402 : i32 to index
      %404 = memref.load %arg5[%403] : memref<72xf32, #tpu.memory_space<smem>>
      %405 = vector.broadcast %404 : f32 to vector<2x81xf32>
      %406 = arith.mulf %405, %28 : vector<2x81xf32>
      %407 = arith.addf %400, %406 : vector<2x81xf32>
      %c6_i32_174 = arith.constant 6 : i32
      %408 = arith.addi %222, %c6_i32_174 : i32
      %c2_i32_175 = arith.constant 2 : i32
      %409 = arith.addi %408, %c2_i32_175 : i32
      %410 = arith.index_cast %409 : i32 to index
      %411 = memref.load %arg5[%410] : memref<72xf32, #tpu.memory_space<smem>>
      %412 = vector.broadcast %411 : f32 to vector<2x81xf32>
      %413 = arith.mulf %412, %30 : vector<2x81xf32>
      %414 = arith.addf %407, %413 : vector<2x81xf32>
      %cst_176 = arith.constant 0.000000e+00 : f32
      %415 = vector.broadcast %cst_176 : f32 to vector<2x81xf32>
      %c0_i32_177 = arith.constant 0 : i32
      %416 = arith.addi %222, %c0_i32_177 : i32
      %c0_i32_178 = arith.constant 0 : i32
      %417 = arith.addi %416, %c0_i32_178 : i32
      %418 = arith.index_cast %417 : i32 to index
      %419 = memref.load %arg5[%418] : memref<72xf32, #tpu.memory_space<smem>>
      %420 = vector.broadcast %419 : f32 to vector<2x81xf32>
      %421 = arith.mulf %420, %12 : vector<2x81xf32>
      %422 = arith.addf %415, %421 : vector<2x81xf32>
      %c0_i32_179 = arith.constant 0 : i32
      %423 = arith.addi %222, %c0_i32_179 : i32
      %c1_i32_180 = arith.constant 1 : i32
      %424 = arith.addi %423, %c1_i32_180 : i32
      %425 = arith.index_cast %424 : i32 to index
      %426 = memref.load %arg5[%425] : memref<72xf32, #tpu.memory_space<smem>>
      %427 = vector.broadcast %426 : f32 to vector<2x81xf32>
      %428 = arith.mulf %427, %14 : vector<2x81xf32>
      %429 = arith.addf %422, %428 : vector<2x81xf32>
      %c0_i32_181 = arith.constant 0 : i32
      %430 = arith.addi %222, %c0_i32_181 : i32
      %c2_i32_182 = arith.constant 2 : i32
      %431 = arith.addi %430, %c2_i32_182 : i32
      %432 = arith.index_cast %431 : i32 to index
      %433 = memref.load %arg5[%432] : memref<72xf32, #tpu.memory_space<smem>>
      %434 = vector.broadcast %433 : f32 to vector<2x81xf32>
      %435 = arith.mulf %434, %16 : vector<2x81xf32>
      %436 = arith.addf %429, %435 : vector<2x81xf32>
      %c3_i32_183 = arith.constant 3 : i32
      %437 = arith.addi %222, %c3_i32_183 : i32
      %c0_i32_184 = arith.constant 0 : i32
      %438 = arith.addi %437, %c0_i32_184 : i32
      %439 = arith.index_cast %438 : i32 to index
      %440 = memref.load %arg5[%439] : memref<72xf32, #tpu.memory_space<smem>>
      %441 = vector.broadcast %440 : f32 to vector<2x81xf32>
      %442 = arith.mulf %441, %20 : vector<2x81xf32>
      %443 = arith.addf %436, %442 : vector<2x81xf32>
      %c3_i32_185 = arith.constant 3 : i32
      %444 = arith.addi %222, %c3_i32_185 : i32
      %c1_i32_186 = arith.constant 1 : i32
      %445 = arith.addi %444, %c1_i32_186 : i32
      %446 = arith.index_cast %445 : i32 to index
      %447 = memref.load %arg5[%446] : memref<72xf32, #tpu.memory_space<smem>>
      %448 = vector.broadcast %447 : f32 to vector<2x81xf32>
      %449 = arith.mulf %448, %22 : vector<2x81xf32>
      %450 = arith.addf %443, %449 : vector<2x81xf32>
      %c3_i32_187 = arith.constant 3 : i32
      %451 = arith.addi %222, %c3_i32_187 : i32
      %c2_i32_188 = arith.constant 2 : i32
      %452 = arith.addi %451, %c2_i32_188 : i32
      %453 = arith.index_cast %452 : i32 to index
      %454 = memref.load %arg5[%453] : memref<72xf32, #tpu.memory_space<smem>>
      %455 = vector.broadcast %454 : f32 to vector<2x81xf32>
      %456 = arith.mulf %455, %24 : vector<2x81xf32>
      %457 = arith.addf %450, %456 : vector<2x81xf32>
      %c6_i32_189 = arith.constant 6 : i32
      %458 = arith.addi %222, %c6_i32_189 : i32
      %c0_i32_190 = arith.constant 0 : i32
      %459 = arith.addi %458, %c0_i32_190 : i32
      %460 = arith.index_cast %459 : i32 to index
      %461 = memref.load %arg5[%460] : memref<72xf32, #tpu.memory_space<smem>>
      %462 = vector.broadcast %461 : f32 to vector<2x81xf32>
      %463 = arith.mulf %462, %28 : vector<2x81xf32>
      %464 = arith.addf %457, %463 : vector<2x81xf32>
      %c6_i32_191 = arith.constant 6 : i32
      %465 = arith.addi %222, %c6_i32_191 : i32
      %c1_i32_192 = arith.constant 1 : i32
      %466 = arith.addi %465, %c1_i32_192 : i32
      %467 = arith.index_cast %466 : i32 to index
      %468 = memref.load %arg5[%467] : memref<72xf32, #tpu.memory_space<smem>>
      %469 = vector.broadcast %468 : f32 to vector<2x81xf32>
      %470 = arith.mulf %469, %30 : vector<2x81xf32>
      %471 = arith.addf %464, %470 : vector<2x81xf32>
      %c6_i32_193 = arith.constant 6 : i32
      %472 = arith.addi %222, %c6_i32_193 : i32
      %c2_i32_194 = arith.constant 2 : i32
      %473 = arith.addi %472, %c2_i32_194 : i32
      %474 = arith.index_cast %473 : i32 to index
      %475 = memref.load %arg5[%474] : memref<72xf32, #tpu.memory_space<smem>>
      %476 = vector.broadcast %475 : f32 to vector<2x81xf32>
      %477 = arith.mulf %476, %32 : vector<2x81xf32>
      %478 = arith.addf %471, %477 : vector<2x81xf32>
      %479 = arith.addf %286, %350 : vector<2x81xf32>
      %480 = arith.addf %479, %414 : vector<2x81xf32>
      %481 = arith.addf %480, %478 : vector<2x81xf32>
      %482 = vector.broadcast %0 : vector<1x81xf32> to vector<2x81xf32>
      %483 = arith.mulf %481, %482 : vector<2x81xf32>
      %484 = arith.mulf %286, %286 : vector<2x81xf32>
      %485 = arith.mulf %350, %350 : vector<2x81xf32>
      %486 = arith.addf %484, %485 : vector<2x81xf32>
      %487 = arith.mulf %414, %414 : vector<2x81xf32>
      %488 = arith.addf %486, %487 : vector<2x81xf32>
      %489 = arith.mulf %478, %478 : vector<2x81xf32>
      %490 = arith.addf %488, %489 : vector<2x81xf32>
      %491 = vector.broadcast %0 : vector<1x81xf32> to vector<2x81xf32>
      %492 = arith.mulf %490, %491 : vector<2x81xf32>
      %493 = vector.shape_cast %483 : vector<2x81xf32> to vector<1x2x81xf32>
      %cst_195 = arith.constant dense<0.000000e+00> : vector<1xf32>
      %494 = vector.multi_reduction <add>, %493, %cst_195 [1, 2] : vector<1x2x81xf32> to vector<1xf32>
      %495 = vector.shape_cast %494 : vector<1xf32> to vector<1x1x1xf32>
      %496 = vector.extract %495[0, 0, 0] : f32 from vector<1x1x1xf32>
      %497 = vector.broadcast %496 : f32 to vector<1x1xf32>
      %cst_196 = arith.constant 5.120000e+02 : f32
      %498 = vector.broadcast %cst_196 : f32 to vector<1x1xf32>
      %499 = arith.divf %497, %498 : vector<1x1xf32>
      %500 = vector.shape_cast %492 : vector<2x81xf32> to vector<1x2x81xf32>
      %cst_197 = arith.constant dense<0.000000e+00> : vector<1xf32>
      %501 = vector.multi_reduction <add>, %500, %cst_197 [1, 2] : vector<1x2x81xf32> to vector<1xf32>
      %502 = vector.shape_cast %501 : vector<1xf32> to vector<1x1x1xf32>
      %503 = vector.extract %502[0, 0, 0] : f32 from vector<1x1x1xf32>
      %504 = vector.broadcast %503 : f32 to vector<1x1xf32>
      %cst_198 = arith.constant 5.120000e+02 : f32
      %505 = vector.broadcast %cst_198 : f32 to vector<1x1xf32>
      %506 = arith.divf %504, %505 : vector<1x1xf32>
      %507 = arith.mulf %499, %499 : vector<1x1xf32>
      %508 = arith.subf %506, %507 : vector<1x1xf32>
      %cst_199 = arith.constant 0.000000e+00 : f32
      %509 = vector.broadcast %cst_199 : f32 to vector<1x1xf32>
      %510 = arith.maximumf %508, %509 : vector<1x1xf32>
      %511 = arith.index_cast %arg10 : i32 to index
      %512 = memref.load %arg7[%511] : memref<24xf32, #tpu.memory_space<smem>>
      %cst_200 = arith.constant 9.99999974E-6 : f32
      %513 = vector.broadcast %cst_200 : f32 to vector<1x1xf32>
      %514 = arith.addf %510, %513 : vector<1x1xf32>
      %515 = math.rsqrt %514 : vector<1x1xf32>
      %516 = vector.broadcast %512 : f32 to vector<1x1xf32>
      %517 = arith.mulf %516, %515 : vector<1x1xf32>
      %c8_i32_201 = arith.constant 8 : i32
      %518 = arith.addi %c8_i32_201, %arg10 : i32
      %519 = arith.index_cast %518 : i32 to index
      %520 = memref.load %arg7[%519] : memref<24xf32, #tpu.memory_space<smem>>
      %521 = arith.mulf %499, %517 : vector<1x1xf32>
      %522 = vector.broadcast %520 : f32 to vector<1x1xf32>
      %523 = arith.subf %522, %521 : vector<1x1xf32>
      %524 = vector.broadcast %517 : vector<1x1xf32> to vector<2x81xf32>
      %525 = arith.mulf %286, %524 : vector<2x81xf32>
      %526 = vector.broadcast %523 : vector<1x1xf32> to vector<2x81xf32>
      %527 = arith.addf %525, %526 : vector<2x81xf32>
      %cst_202 = arith.constant 0.000000e+00 : f32
      %528 = vector.broadcast %cst_202 : f32 to vector<2x81xf32>
      %529 = arith.maximumf %527, %528 : vector<2x81xf32>
      %530 = vector.broadcast %517 : vector<1x1xf32> to vector<2x81xf32>
      %531 = arith.mulf %350, %530 : vector<2x81xf32>
      %532 = vector.broadcast %523 : vector<1x1xf32> to vector<2x81xf32>
      %533 = arith.addf %531, %532 : vector<2x81xf32>
      %cst_203 = arith.constant 0.000000e+00 : f32
      %534 = vector.broadcast %cst_203 : f32 to vector<2x81xf32>
      %535 = arith.maximumf %533, %534 : vector<2x81xf32>
      %536 = vector.broadcast %517 : vector<1x1xf32> to vector<2x81xf32>
      %537 = arith.mulf %414, %536 : vector<2x81xf32>
      %538 = vector.broadcast %523 : vector<1x1xf32> to vector<2x81xf32>
      %539 = arith.addf %537, %538 : vector<2x81xf32>
      %cst_204 = arith.constant 0.000000e+00 : f32
      %540 = vector.broadcast %cst_204 : f32 to vector<2x81xf32>
      %541 = arith.maximumf %539, %540 : vector<2x81xf32>
      %542 = vector.broadcast %517 : vector<1x1xf32> to vector<2x81xf32>
      %543 = arith.mulf %478, %542 : vector<2x81xf32>
      %544 = vector.broadcast %523 : vector<1x1xf32> to vector<2x81xf32>
      %545 = arith.addf %543, %544 : vector<2x81xf32>
      %cst_205 = arith.constant 0.000000e+00 : f32
      %546 = vector.broadcast %cst_205 : f32 to vector<2x81xf32>
      %547 = arith.maximumf %545, %546 : vector<2x81xf32>
      %548 = arith.maximumf %529, %535 : vector<2x81xf32>
      %549 = arith.maximumf %541, %547 : vector<2x81xf32>
      %550 = arith.maximumf %548, %549 : vector<2x81xf32>
      %551 = tpu.concatenate %33, %550, %34 in 1 : vector<2x10xf32>, vector<2x81xf32>, vector<2x57xf32> -> vector<2x148xf32>
      %552 = arith.index_cast %arg10 : i32 to index
      %c0_206 = arith.constant 0 : index
      %c0_207 = arith.constant 0 : index
      %553 = vector.load %arg9[%552, %c0_206, %c0_207] : memref<8x2x148xf32, #tpu.memory_space<vmem>>, vector<1x2x148xf32>
      %554 = vector.shape_cast %553 : vector<1x2x148xf32> to vector<2x148xf32>
      %555 = vector.shape_cast %551 : vector<2x148xf32> to vector<1x2x148xf32>
      tpu.vector_store %arg9[%552, %c0_206, %c0_207], %555 {strides = array<i32>} : memref<8x2x148xf32, #tpu.memory_space<vmem>>, vector<1x2x148xf32>,
    }
    %c8_i32_45 = arith.constant 8 : i32
    %c0_46 = arith.constant 0 : index
    %c0_47 = arith.constant 0 : index
    %c0_48 = arith.constant 0 : index
    %36 = vector.load %arg2[%c0_46, %c0_47, %c0_48] : memref<9x1x128xf32, #tpu.memory_space<vmem>>, vector<1x1x128xf32>
    %37 = vector.shape_cast %36 : vector<1x1x128xf32> to vector<1x128xf32>
    %c1_49 = arith.constant 1 : index
    %c0_50 = arith.constant 0 : index
    %c0_51 = arith.constant 0 : index
    %38 = vector.load %arg2[%c1_49, %c0_50, %c0_51] : memref<9x1x128xf32, #tpu.memory_space<vmem>>, vector<1x1x128xf32>
    %39 = vector.shape_cast %38 : vector<1x1x128xf32> to vector<1x128xf32>
    %c2_52 = arith.constant 2 : index
    %c0_53 = arith.constant 0 : index
    %c0_54 = arith.constant 0 : index
    %40 = vector.load %arg2[%c2_52, %c0_53, %c0_54] : memref<9x1x128xf32, #tpu.memory_space<vmem>>, vector<1x1x128xf32>
    %41 = vector.shape_cast %40 : vector<1x1x128xf32> to vector<1x128xf32>
    %c3_55 = arith.constant 3 : index
    %c0_56 = arith.constant 0 : index
    %c0_57 = arith.constant 0 : index
    %42 = vector.load %arg2[%c3_55, %c0_56, %c0_57] : memref<9x1x128xf32, #tpu.memory_space<vmem>>, vector<1x1x128xf32>
    %43 = vector.shape_cast %42 : vector<1x1x128xf32> to vector<1x128xf32>
    %c4 = arith.constant 4 : index
    %c0_58 = arith.constant 0 : index
    %c0_59 = arith.constant 0 : index
    %44 = vector.load %arg2[%c4, %c0_58, %c0_59] : memref<9x1x128xf32, #tpu.memory_space<vmem>>, vector<1x1x128xf32>
    %45 = vector.shape_cast %44 : vector<1x1x128xf32> to vector<1x128xf32>
    %c5 = arith.constant 5 : index
    %c0_60 = arith.constant 0 : index
    %c0_61 = arith.constant 0 : index
    %46 = vector.load %arg2[%c5, %c0_60, %c0_61] : memref<9x1x128xf32, #tpu.memory_space<vmem>>, vector<1x1x128xf32>
    %47 = vector.shape_cast %46 : vector<1x1x128xf32> to vector<1x128xf32>
    %c6 = arith.constant 6 : index
    %c0_62 = arith.constant 0 : index
    %c0_63 = arith.constant 0 : index
    %48 = vector.load %arg2[%c6, %c0_62, %c0_63] : memref<9x1x128xf32, #tpu.memory_space<vmem>>, vector<1x1x128xf32>
    %49 = vector.shape_cast %48 : vector<1x1x128xf32> to vector<1x128xf32>
    %c7 = arith.constant 7 : index
    %c0_64 = arith.constant 0 : index
    %c0_65 = arith.constant 0 : index
    %50 = vector.load %arg2[%c7, %c0_64, %c0_65] : memref<9x1x128xf32, #tpu.memory_space<vmem>>, vector<1x1x128xf32>
    %51 = vector.shape_cast %50 : vector<1x1x128xf32> to vector<1x128xf32>
    %c8 = arith.constant 8 : index
    %c0_66 = arith.constant 0 : index
    %c0_67 = arith.constant 0 : index
    %52 = vector.load %arg2[%c8, %c0_66, %c0_67] : memref<9x1x128xf32, #tpu.memory_space<vmem>>, vector<1x1x128xf32>
    %53 = vector.shape_cast %52 : vector<1x1x128xf32> to vector<1x128xf32>
    %cst_68 = arith.constant 0.000000e+00 : f32
    %54 = vector.broadcast %cst_68 : f32 to vector<2x128xf32>
    %c0_i32_69 = arith.constant 0 : i32
    %c8_i32_70 = arith.constant 8 : i32
    %55 = arith.addi %c0_i32_69, %c8_i32_70 : i32
    %c1_i32_71 = arith.constant 1 : i32
    %56:4 = scf.for %arg10 = %c0_i32_69 to %55 step %c1_i32_71 iter_args(%arg11 = %54, %arg12 = %54, %arg13 = %54, %arg14 = %54) -> (vector<2x128xf32>, vector<2x128xf32>, vector<2x128xf32>, vector<2x128xf32>)  : i32 {
      %222 = arith.index_cast %arg10 : i32 to index
      %c0_122 = arith.constant 0 : index
      %c0_123 = arith.constant 0 : index
      %223 = vector.load %arg9[%222, %c0_122, %c0_123] : memref<8x2x148xf32, #tpu.memory_space<vmem>>, vector<1x2x148xf32>
      %224 = vector.shape_cast %223 : vector<1x2x148xf32> to vector<2x148xf32>
      %c9_i32 = arith.constant 9 : i32
      %225 = arith.muli %arg10, %c9_i32 : i32
      %226 = vector.extract_strided_slice %224 {offsets = [0, 0], sizes = [2, 128], strides = [1, 1]} : vector<2x148xf32> to vector<2x128xf32>
      %227 = vector.broadcast %37 : vector<1x128xf32> to vector<2x128xf32>
      %228 = arith.mulf %226, %227 : vector<2x128xf32>
      %c0_i32_124 = arith.constant 0 : i32
      %229 = arith.addi %c0_i32_124, %225 : i32
      %c0_i32_125 = arith.constant 0 : i32
      %230 = arith.addi %229, %c0_i32_125 : i32
      %231 = arith.index_cast %230 : i32 to index
      %232 = memref.load %arg6[%231] : memref<288xf32, #tpu.memory_space<smem>>
      %233 = vector.broadcast %232 : f32 to vector<2x128xf32>
      %234 = arith.mulf %233, %228 : vector<2x128xf32>
      %235 = arith.addf %arg11, %234 : vector<2x128xf32>
      %c72_i32 = arith.constant 72 : i32
      %236 = arith.addi %c72_i32, %225 : i32
      %c0_i32_126 = arith.constant 0 : i32
      %237 = arith.addi %236, %c0_i32_126 : i32
      %238 = arith.index_cast %237 : i32 to index
      %239 = memref.load %arg6[%238] : memref<288xf32, #tpu.memory_space<smem>>
      %240 = vector.broadcast %239 : f32 to vector<2x128xf32>
      %241 = arith.mulf %240, %228 : vector<2x128xf32>
      %242 = arith.addf %arg12, %241 : vector<2x128xf32>
      %c144_i32 = arith.constant 144 : i32
      %243 = arith.addi %c144_i32, %225 : i32
      %c0_i32_127 = arith.constant 0 : i32
      %244 = arith.addi %243, %c0_i32_127 : i32
      %245 = arith.index_cast %244 : i32 to index
      %246 = memref.load %arg6[%245] : memref<288xf32, #tpu.memory_space<smem>>
      %247 = vector.broadcast %246 : f32 to vector<2x128xf32>
      %248 = arith.mulf %247, %228 : vector<2x128xf32>
      %249 = arith.addf %arg13, %248 : vector<2x128xf32>
      %c216_i32 = arith.constant 216 : i32
      %250 = arith.addi %c216_i32, %225 : i32
      %c0_i32_128 = arith.constant 0 : i32
      %251 = arith.addi %250, %c0_i32_128 : i32
      %252 = arith.index_cast %251 : i32 to index
      %253 = memref.load %arg6[%252] : memref<288xf32, #tpu.memory_space<smem>>
      %254 = vector.broadcast %253 : f32 to vector<2x128xf32>
      %255 = arith.mulf %254, %228 : vector<2x128xf32>
      %256 = arith.addf %arg14, %255 : vector<2x128xf32>
      %257 = vector.extract_strided_slice %224 {offsets = [0, 1], sizes = [2, 128], strides = [1, 1]} : vector<2x148xf32> to vector<2x128xf32>
      %258 = vector.broadcast %39 : vector<1x128xf32> to vector<2x128xf32>
      %259 = arith.mulf %257, %258 : vector<2x128xf32>
      %c0_i32_129 = arith.constant 0 : i32
      %260 = arith.addi %c0_i32_129, %225 : i32
      %c1_i32_130 = arith.constant 1 : i32
      %261 = arith.addi %260, %c1_i32_130 : i32
      %262 = arith.index_cast %261 : i32 to index
      %263 = memref.load %arg6[%262] : memref<288xf32, #tpu.memory_space<smem>>
      %264 = vector.broadcast %263 : f32 to vector<2x128xf32>
      %265 = arith.mulf %264, %259 : vector<2x128xf32>
      %266 = arith.addf %235, %265 : vector<2x128xf32>
      %c72_i32_131 = arith.constant 72 : i32
      %267 = arith.addi %c72_i32_131, %225 : i32
      %c1_i32_132 = arith.constant 1 : i32
      %268 = arith.addi %267, %c1_i32_132 : i32
      %269 = arith.index_cast %268 : i32 to index
      %270 = memref.load %arg6[%269] : memref<288xf32, #tpu.memory_space<smem>>
      %271 = vector.broadcast %270 : f32 to vector<2x128xf32>
      %272 = arith.mulf %271, %259 : vector<2x128xf32>
      %273 = arith.addf %242, %272 : vector<2x128xf32>
      %c144_i32_133 = arith.constant 144 : i32
      %274 = arith.addi %c144_i32_133, %225 : i32
      %c1_i32_134 = arith.constant 1 : i32
      %275 = arith.addi %274, %c1_i32_134 : i32
      %276 = arith.index_cast %275 : i32 to index
      %277 = memref.load %arg6[%276] : memref<288xf32, #tpu.memory_space<smem>>
      %278 = vector.broadcast %277 : f32 to vector<2x128xf32>
      %279 = arith.mulf %278, %259 : vector<2x128xf32>
      %280 = arith.addf %249, %279 : vector<2x128xf32>
      %c216_i32_135 = arith.constant 216 : i32
      %281 = arith.addi %c216_i32_135, %225 : i32
      %c1_i32_136 = arith.constant 1 : i32
      %282 = arith.addi %281, %c1_i32_136 : i32
      %283 = arith.index_cast %282 : i32 to index
      %284 = memref.load %arg6[%283] : memref<288xf32, #tpu.memory_space<smem>>
      %285 = vector.broadcast %284 : f32 to vector<2x128xf32>
      %286 = arith.mulf %285, %259 : vector<2x128xf32>
      %287 = arith.addf %256, %286 : vector<2x128xf32>
      %288 = vector.extract_strided_slice %224 {offsets = [0, 2], sizes = [2, 128], strides = [1, 1]} : vector<2x148xf32> to vector<2x128xf32>
      %289 = vector.broadcast %41 : vector<1x128xf32> to vector<2x128xf32>
      %290 = arith.mulf %288, %289 : vector<2x128xf32>
      %c0_i32_137 = arith.constant 0 : i32
      %291 = arith.addi %c0_i32_137, %225 : i32
      %c2_i32 = arith.constant 2 : i32
      %292 = arith.addi %291, %c2_i32 : i32
      %293 = arith.index_cast %292 : i32 to index
      %294 = memref.load %arg6[%293] : memref<288xf32, #tpu.memory_space<smem>>
      %295 = vector.broadcast %294 : f32 to vector<2x128xf32>
      %296 = arith.mulf %295, %290 : vector<2x128xf32>
      %297 = arith.addf %266, %296 : vector<2x128xf32>
      %c72_i32_138 = arith.constant 72 : i32
      %298 = arith.addi %c72_i32_138, %225 : i32
      %c2_i32_139 = arith.constant 2 : i32
      %299 = arith.addi %298, %c2_i32_139 : i32
      %300 = arith.index_cast %299 : i32 to index
      %301 = memref.load %arg6[%300] : memref<288xf32, #tpu.memory_space<smem>>
      %302 = vector.broadcast %301 : f32 to vector<2x128xf32>
      %303 = arith.mulf %302, %290 : vector<2x128xf32>
      %304 = arith.addf %273, %303 : vector<2x128xf32>
      %c144_i32_140 = arith.constant 144 : i32
      %305 = arith.addi %c144_i32_140, %225 : i32
      %c2_i32_141 = arith.constant 2 : i32
      %306 = arith.addi %305, %c2_i32_141 : i32
      %307 = arith.index_cast %306 : i32 to index
      %308 = memref.load %arg6[%307] : memref<288xf32, #tpu.memory_space<smem>>
      %309 = vector.broadcast %308 : f32 to vector<2x128xf32>
      %310 = arith.mulf %309, %290 : vector<2x128xf32>
      %311 = arith.addf %280, %310 : vector<2x128xf32>
      %c216_i32_142 = arith.constant 216 : i32
      %312 = arith.addi %c216_i32_142, %225 : i32
      %c2_i32_143 = arith.constant 2 : i32
      %313 = arith.addi %312, %c2_i32_143 : i32
      %314 = arith.index_cast %313 : i32 to index
      %315 = memref.load %arg6[%314] : memref<288xf32, #tpu.memory_space<smem>>
      %316 = vector.broadcast %315 : f32 to vector<2x128xf32>
      %317 = arith.mulf %316, %290 : vector<2x128xf32>
      %318 = arith.addf %287, %317 : vector<2x128xf32>
      %319 = vector.extract_strided_slice %224 {offsets = [0, 9], sizes = [2, 128], strides = [1, 1]} : vector<2x148xf32> to vector<2x128xf32>
      %320 = vector.broadcast %43 : vector<1x128xf32> to vector<2x128xf32>
      %321 = arith.mulf %319, %320 : vector<2x128xf32>
      %c0_i32_144 = arith.constant 0 : i32
      %322 = arith.addi %c0_i32_144, %225 : i32
      %c3_i32 = arith.constant 3 : i32
      %323 = arith.addi %322, %c3_i32 : i32
      %324 = arith.index_cast %323 : i32 to index
      %325 = memref.load %arg6[%324] : memref<288xf32, #tpu.memory_space<smem>>
      %326 = vector.broadcast %325 : f32 to vector<2x128xf32>
      %327 = arith.mulf %326, %321 : vector<2x128xf32>
      %328 = arith.addf %297, %327 : vector<2x128xf32>
      %c72_i32_145 = arith.constant 72 : i32
      %329 = arith.addi %c72_i32_145, %225 : i32
      %c3_i32_146 = arith.constant 3 : i32
      %330 = arith.addi %329, %c3_i32_146 : i32
      %331 = arith.index_cast %330 : i32 to index
      %332 = memref.load %arg6[%331] : memref<288xf32, #tpu.memory_space<smem>>
      %333 = vector.broadcast %332 : f32 to vector<2x128xf32>
      %334 = arith.mulf %333, %321 : vector<2x128xf32>
      %335 = arith.addf %304, %334 : vector<2x128xf32>
      %c144_i32_147 = arith.constant 144 : i32
      %336 = arith.addi %c144_i32_147, %225 : i32
      %c3_i32_148 = arith.constant 3 : i32
      %337 = arith.addi %336, %c3_i32_148 : i32
      %338 = arith.index_cast %337 : i32 to index
      %339 = memref.load %arg6[%338] : memref<288xf32, #tpu.memory_space<smem>>
      %340 = vector.broadcast %339 : f32 to vector<2x128xf32>
      %341 = arith.mulf %340, %321 : vector<2x128xf32>
      %342 = arith.addf %311, %341 : vector<2x128xf32>
      %c216_i32_149 = arith.constant 216 : i32
      %343 = arith.addi %c216_i32_149, %225 : i32
      %c3_i32_150 = arith.constant 3 : i32
      %344 = arith.addi %343, %c3_i32_150 : i32
      %345 = arith.index_cast %344 : i32 to index
      %346 = memref.load %arg6[%345] : memref<288xf32, #tpu.memory_space<smem>>
      %347 = vector.broadcast %346 : f32 to vector<2x128xf32>
      %348 = arith.mulf %347, %321 : vector<2x128xf32>
      %349 = arith.addf %318, %348 : vector<2x128xf32>
      %350 = vector.extract_strided_slice %224 {offsets = [0, 10], sizes = [2, 128], strides = [1, 1]} : vector<2x148xf32> to vector<2x128xf32>
      %351 = vector.broadcast %45 : vector<1x128xf32> to vector<2x128xf32>
      %352 = arith.mulf %350, %351 : vector<2x128xf32>
      %c0_i32_151 = arith.constant 0 : i32
      %353 = arith.addi %c0_i32_151, %225 : i32
      %c4_i32 = arith.constant 4 : i32
      %354 = arith.addi %353, %c4_i32 : i32
      %355 = arith.index_cast %354 : i32 to index
      %356 = memref.load %arg6[%355] : memref<288xf32, #tpu.memory_space<smem>>
      %357 = vector.broadcast %356 : f32 to vector<2x128xf32>
      %358 = arith.mulf %357, %352 : vector<2x128xf32>
      %359 = arith.addf %328, %358 : vector<2x128xf32>
      %c72_i32_152 = arith.constant 72 : i32
      %360 = arith.addi %c72_i32_152, %225 : i32
      %c4_i32_153 = arith.constant 4 : i32
      %361 = arith.addi %360, %c4_i32_153 : i32
      %362 = arith.index_cast %361 : i32 to index
      %363 = memref.load %arg6[%362] : memref<288xf32, #tpu.memory_space<smem>>
      %364 = vector.broadcast %363 : f32 to vector<2x128xf32>
      %365 = arith.mulf %364, %352 : vector<2x128xf32>
      %366 = arith.addf %335, %365 : vector<2x128xf32>
      %c144_i32_154 = arith.constant 144 : i32
      %367 = arith.addi %c144_i32_154, %225 : i32
      %c4_i32_155 = arith.constant 4 : i32
      %368 = arith.addi %367, %c4_i32_155 : i32
      %369 = arith.index_cast %368 : i32 to index
      %370 = memref.load %arg6[%369] : memref<288xf32, #tpu.memory_space<smem>>
      %371 = vector.broadcast %370 : f32 to vector<2x128xf32>
      %372 = arith.mulf %371, %352 : vector<2x128xf32>
      %373 = arith.addf %342, %372 : vector<2x128xf32>
      %c216_i32_156 = arith.constant 216 : i32
      %374 = arith.addi %c216_i32_156, %225 : i32
      %c4_i32_157 = arith.constant 4 : i32
      %375 = arith.addi %374, %c4_i32_157 : i32
      %376 = arith.index_cast %375 : i32 to index
      %377 = memref.load %arg6[%376] : memref<288xf32, #tpu.memory_space<smem>>
      %378 = vector.broadcast %377 : f32 to vector<2x128xf32>
      %379 = arith.mulf %378, %352 : vector<2x128xf32>
      %380 = arith.addf %349, %379 : vector<2x128xf32>
      %381 = vector.extract_strided_slice %224 {offsets = [0, 11], sizes = [2, 128], strides = [1, 1]} : vector<2x148xf32> to vector<2x128xf32>
      %382 = vector.broadcast %47 : vector<1x128xf32> to vector<2x128xf32>
      %383 = arith.mulf %381, %382 : vector<2x128xf32>
      %c0_i32_158 = arith.constant 0 : i32
      %384 = arith.addi %c0_i32_158, %225 : i32
      %c5_i32 = arith.constant 5 : i32
      %385 = arith.addi %384, %c5_i32 : i32
      %386 = arith.index_cast %385 : i32 to index
      %387 = memref.load %arg6[%386] : memref<288xf32, #tpu.memory_space<smem>>
      %388 = vector.broadcast %387 : f32 to vector<2x128xf32>
      %389 = arith.mulf %388, %383 : vector<2x128xf32>
      %390 = arith.addf %359, %389 : vector<2x128xf32>
      %c72_i32_159 = arith.constant 72 : i32
      %391 = arith.addi %c72_i32_159, %225 : i32
      %c5_i32_160 = arith.constant 5 : i32
      %392 = arith.addi %391, %c5_i32_160 : i32
      %393 = arith.index_cast %392 : i32 to index
      %394 = memref.load %arg6[%393] : memref<288xf32, #tpu.memory_space<smem>>
      %395 = vector.broadcast %394 : f32 to vector<2x128xf32>
      %396 = arith.mulf %395, %383 : vector<2x128xf32>
      %397 = arith.addf %366, %396 : vector<2x128xf32>
      %c144_i32_161 = arith.constant 144 : i32
      %398 = arith.addi %c144_i32_161, %225 : i32
      %c5_i32_162 = arith.constant 5 : i32
      %399 = arith.addi %398, %c5_i32_162 : i32
      %400 = arith.index_cast %399 : i32 to index
      %401 = memref.load %arg6[%400] : memref<288xf32, #tpu.memory_space<smem>>
      %402 = vector.broadcast %401 : f32 to vector<2x128xf32>
      %403 = arith.mulf %402, %383 : vector<2x128xf32>
      %404 = arith.addf %373, %403 : vector<2x128xf32>
      %c216_i32_163 = arith.constant 216 : i32
      %405 = arith.addi %c216_i32_163, %225 : i32
      %c5_i32_164 = arith.constant 5 : i32
      %406 = arith.addi %405, %c5_i32_164 : i32
      %407 = arith.index_cast %406 : i32 to index
      %408 = memref.load %arg6[%407] : memref<288xf32, #tpu.memory_space<smem>>
      %409 = vector.broadcast %408 : f32 to vector<2x128xf32>
      %410 = arith.mulf %409, %383 : vector<2x128xf32>
      %411 = arith.addf %380, %410 : vector<2x128xf32>
      %412 = vector.extract_strided_slice %224 {offsets = [0, 18], sizes = [2, 128], strides = [1, 1]} : vector<2x148xf32> to vector<2x128xf32>
      %413 = vector.broadcast %49 : vector<1x128xf32> to vector<2x128xf32>
      %414 = arith.mulf %412, %413 : vector<2x128xf32>
      %c0_i32_165 = arith.constant 0 : i32
      %415 = arith.addi %c0_i32_165, %225 : i32
      %c6_i32 = arith.constant 6 : i32
      %416 = arith.addi %415, %c6_i32 : i32
      %417 = arith.index_cast %416 : i32 to index
      %418 = memref.load %arg6[%417] : memref<288xf32, #tpu.memory_space<smem>>
      %419 = vector.broadcast %418 : f32 to vector<2x128xf32>
      %420 = arith.mulf %419, %414 : vector<2x128xf32>
      %421 = arith.addf %390, %420 : vector<2x128xf32>
      %c72_i32_166 = arith.constant 72 : i32
      %422 = arith.addi %c72_i32_166, %225 : i32
      %c6_i32_167 = arith.constant 6 : i32
      %423 = arith.addi %422, %c6_i32_167 : i32
      %424 = arith.index_cast %423 : i32 to index
      %425 = memref.load %arg6[%424] : memref<288xf32, #tpu.memory_space<smem>>
      %426 = vector.broadcast %425 : f32 to vector<2x128xf32>
      %427 = arith.mulf %426, %414 : vector<2x128xf32>
      %428 = arith.addf %397, %427 : vector<2x128xf32>
      %c144_i32_168 = arith.constant 144 : i32
      %429 = arith.addi %c144_i32_168, %225 : i32
      %c6_i32_169 = arith.constant 6 : i32
      %430 = arith.addi %429, %c6_i32_169 : i32
      %431 = arith.index_cast %430 : i32 to index
      %432 = memref.load %arg6[%431] : memref<288xf32, #tpu.memory_space<smem>>
      %433 = vector.broadcast %432 : f32 to vector<2x128xf32>
      %434 = arith.mulf %433, %414 : vector<2x128xf32>
      %435 = arith.addf %404, %434 : vector<2x128xf32>
      %c216_i32_170 = arith.constant 216 : i32
      %436 = arith.addi %c216_i32_170, %225 : i32
      %c6_i32_171 = arith.constant 6 : i32
      %437 = arith.addi %436, %c6_i32_171 : i32
      %438 = arith.index_cast %437 : i32 to index
      %439 = memref.load %arg6[%438] : memref<288xf32, #tpu.memory_space<smem>>
      %440 = vector.broadcast %439 : f32 to vector<2x128xf32>
      %441 = arith.mulf %440, %414 : vector<2x128xf32>
      %442 = arith.addf %411, %441 : vector<2x128xf32>
      %443 = vector.extract_strided_slice %224 {offsets = [0, 19], sizes = [2, 128], strides = [1, 1]} : vector<2x148xf32> to vector<2x128xf32>
      %444 = vector.broadcast %51 : vector<1x128xf32> to vector<2x128xf32>
      %445 = arith.mulf %443, %444 : vector<2x128xf32>
      %c0_i32_172 = arith.constant 0 : i32
      %446 = arith.addi %c0_i32_172, %225 : i32
      %c7_i32 = arith.constant 7 : i32
      %447 = arith.addi %446, %c7_i32 : i32
      %448 = arith.index_cast %447 : i32 to index
      %449 = memref.load %arg6[%448] : memref<288xf32, #tpu.memory_space<smem>>
      %450 = vector.broadcast %449 : f32 to vector<2x128xf32>
      %451 = arith.mulf %450, %445 : vector<2x128xf32>
      %452 = arith.addf %421, %451 : vector<2x128xf32>
      %c72_i32_173 = arith.constant 72 : i32
      %453 = arith.addi %c72_i32_173, %225 : i32
      %c7_i32_174 = arith.constant 7 : i32
      %454 = arith.addi %453, %c7_i32_174 : i32
      %455 = arith.index_cast %454 : i32 to index
      %456 = memref.load %arg6[%455] : memref<288xf32, #tpu.memory_space<smem>>
      %457 = vector.broadcast %456 : f32 to vector<2x128xf32>
      %458 = arith.mulf %457, %445 : vector<2x128xf32>
      %459 = arith.addf %428, %458 : vector<2x128xf32>
      %c144_i32_175 = arith.constant 144 : i32
      %460 = arith.addi %c144_i32_175, %225 : i32
      %c7_i32_176 = arith.constant 7 : i32
      %461 = arith.addi %460, %c7_i32_176 : i32
      %462 = arith.index_cast %461 : i32 to index
      %463 = memref.load %arg6[%462] : memref<288xf32, #tpu.memory_space<smem>>
      %464 = vector.broadcast %463 : f32 to vector<2x128xf32>
      %465 = arith.mulf %464, %445 : vector<2x128xf32>
      %466 = arith.addf %435, %465 : vector<2x128xf32>
      %c216_i32_177 = arith.constant 216 : i32
      %467 = arith.addi %c216_i32_177, %225 : i32
      %c7_i32_178 = arith.constant 7 : i32
      %468 = arith.addi %467, %c7_i32_178 : i32
      %469 = arith.index_cast %468 : i32 to index
      %470 = memref.load %arg6[%469] : memref<288xf32, #tpu.memory_space<smem>>
      %471 = vector.broadcast %470 : f32 to vector<2x128xf32>
      %472 = arith.mulf %471, %445 : vector<2x128xf32>
      %473 = arith.addf %442, %472 : vector<2x128xf32>
      %474 = vector.extract_strided_slice %224 {offsets = [0, 20], sizes = [2, 128], strides = [1, 1]} : vector<2x148xf32> to vector<2x128xf32>
      %475 = vector.broadcast %53 : vector<1x128xf32> to vector<2x128xf32>
      %476 = arith.mulf %474, %475 : vector<2x128xf32>
      %c0_i32_179 = arith.constant 0 : i32
      %477 = arith.addi %c0_i32_179, %225 : i32
      %c8_i32_180 = arith.constant 8 : i32
      %478 = arith.addi %477, %c8_i32_180 : i32
      %479 = arith.index_cast %478 : i32 to index
      %480 = memref.load %arg6[%479] : memref<288xf32, #tpu.memory_space<smem>>
      %481 = vector.broadcast %480 : f32 to vector<2x128xf32>
      %482 = arith.mulf %481, %476 : vector<2x128xf32>
      %483 = arith.addf %452, %482 : vector<2x128xf32>
      %c72_i32_181 = arith.constant 72 : i32
      %484 = arith.addi %c72_i32_181, %225 : i32
      %c8_i32_182 = arith.constant 8 : i32
      %485 = arith.addi %484, %c8_i32_182 : i32
      %486 = arith.index_cast %485 : i32 to index
      %487 = memref.load %arg6[%486] : memref<288xf32, #tpu.memory_space<smem>>
      %488 = vector.broadcast %487 : f32 to vector<2x128xf32>
      %489 = arith.mulf %488, %476 : vector<2x128xf32>
      %490 = arith.addf %459, %489 : vector<2x128xf32>
      %c144_i32_183 = arith.constant 144 : i32
      %491 = arith.addi %c144_i32_183, %225 : i32
      %c8_i32_184 = arith.constant 8 : i32
      %492 = arith.addi %491, %c8_i32_184 : i32
      %493 = arith.index_cast %492 : i32 to index
      %494 = memref.load %arg6[%493] : memref<288xf32, #tpu.memory_space<smem>>
      %495 = vector.broadcast %494 : f32 to vector<2x128xf32>
      %496 = arith.mulf %495, %476 : vector<2x128xf32>
      %497 = arith.addf %466, %496 : vector<2x128xf32>
      %c216_i32_185 = arith.constant 216 : i32
      %498 = arith.addi %c216_i32_185, %225 : i32
      %c8_i32_186 = arith.constant 8 : i32
      %499 = arith.addi %498, %c8_i32_186 : i32
      %500 = arith.index_cast %499 : i32 to index
      %501 = memref.load %arg6[%500] : memref<288xf32, #tpu.memory_space<smem>>
      %502 = vector.broadcast %501 : f32 to vector<2x128xf32>
      %503 = arith.mulf %502, %476 : vector<2x128xf32>
      %504 = arith.addf %473, %503 : vector<2x128xf32>
      scf.yield %483, %490, %497, %504 : vector<2x128xf32>, vector<2x128xf32>, vector<2x128xf32>, vector<2x128xf32>
    }
    %c8_i32_72 = arith.constant 8 : i32
    %cst_73 = arith.constant 0.000000e+00 : f32
    %57 = vector.broadcast %cst_73 : f32 to vector<2x16xf32>
    %58 = vector.shape_cast %56#0 : vector<2x128xf32> to vector<1x2x128xf32>
    %cst_74 = arith.constant dense<0.000000e+00> : vector<1xf32>
    %59 = vector.multi_reduction <add>, %58, %cst_74 [1, 2] : vector<1x2x128xf32> to vector<1xf32>
    %60 = vector.shape_cast %59 : vector<1xf32> to vector<1x1x1xf32>
    %61 = vector.extract %60[0, 0, 0] : f32 from vector<1x1x1xf32>
    %62 = vector.broadcast %61 : f32 to vector<1x1xf32>
    %cst_75 = arith.constant 1.280000e+02 : f32
    %63 = vector.broadcast %cst_75 : f32 to vector<1x1xf32>
    %64 = arith.divf %62, %63 : vector<1x1xf32>
    %65 = arith.mulf %56#0, %56#0 : vector<2x128xf32>
    %66 = vector.shape_cast %65 : vector<2x128xf32> to vector<1x2x128xf32>
    %cst_76 = arith.constant dense<0.000000e+00> : vector<1xf32>
    %67 = vector.multi_reduction <add>, %66, %cst_76 [1, 2] : vector<1x2x128xf32> to vector<1xf32>
    %68 = vector.shape_cast %67 : vector<1xf32> to vector<1x1x1xf32>
    %69 = vector.extract %68[0, 0, 0] : f32 from vector<1x1x1xf32>
    %70 = vector.broadcast %69 : f32 to vector<1x1xf32>
    %cst_77 = arith.constant 1.280000e+02 : f32
    %71 = vector.broadcast %cst_77 : f32 to vector<1x1xf32>
    %72 = arith.divf %70, %71 : vector<1x1xf32>
    %73 = arith.mulf %64, %64 : vector<1x1xf32>
    %74 = arith.subf %72, %73 : vector<1x1xf32>
    %cst_78 = arith.constant 0.000000e+00 : f32
    %75 = vector.broadcast %cst_78 : f32 to vector<1x1xf32>
    %76 = arith.maximumf %74, %75 : vector<1x1xf32>
    %c16 = arith.constant 16 : index
    %77 = memref.load %arg7[%c16] : memref<24xf32, #tpu.memory_space<smem>>
    %cst_79 = arith.constant 9.99999974E-6 : f32
    %78 = vector.broadcast %cst_79 : f32 to vector<1x1xf32>
    %79 = arith.addf %76, %78 : vector<1x1xf32>
    %80 = math.rsqrt %79 : vector<1x1xf32>
    %81 = vector.broadcast %77 : f32 to vector<1x1xf32>
    %82 = arith.mulf %81, %80 : vector<1x1xf32>
    %c20 = arith.constant 20 : index
    %83 = memref.load %arg7[%c20] : memref<24xf32, #tpu.memory_space<smem>>
    %84 = arith.mulf %64, %82 : vector<1x1xf32>
    %85 = vector.broadcast %83 : f32 to vector<1x1xf32>
    %86 = arith.subf %85, %84 : vector<1x1xf32>
    %87 = vector.broadcast %82 : vector<1x1xf32> to vector<2x128xf32>
    %88 = arith.mulf %56#0, %87 : vector<2x128xf32>
    %89 = vector.broadcast %86 : vector<1x1xf32> to vector<2x128xf32>
    %90 = arith.addf %88, %89 : vector<2x128xf32>
    %cst_80 = arith.constant 0.000000e+00 : f32
    %91 = vector.broadcast %cst_80 : f32 to vector<2x128xf32>
    %92 = arith.maximumf %90, %91 : vector<2x128xf32>
    %93 = arith.truncf %92 : vector<2x128xf32> to vector<2x128xbf16>
    %c0_81 = arith.constant 0 : index
    %c0_82 = arith.constant 0 : index
    %c0_83 = arith.constant 0 : index
    %94 = vector.load %arg3[%c0_81, %c0_82, %c0_83] : memref<4x128x16xbf16, #tpu.memory_space<vmem>>, vector<1x128x16xbf16>
    %95 = vector.shape_cast %94 : vector<1x128x16xbf16> to vector<128x16xbf16>
    %cst_84 = arith.constant dense<0.000000e+00> : vector<2x16xf32>
    %96 = tpu.matmul %93, %95, %cst_84 {dimension_numbers = #tpu.dot_dimension_numbers<[1], [0], [0], [1], [0, 0, 1, 1], [], []>} : vector<2x128xbf16>, vector<128x16xbf16>, vector<2x16xf32> -> vector<2x16xf32>
    %97 = arith.addf %57, %96 : vector<2x16xf32>
    %98 = vector.shape_cast %56#1 : vector<2x128xf32> to vector<1x2x128xf32>
    %cst_85 = arith.constant dense<0.000000e+00> : vector<1xf32>
    %99 = vector.multi_reduction <add>, %98, %cst_85 [1, 2] : vector<1x2x128xf32> to vector<1xf32>
    %100 = vector.shape_cast %99 : vector<1xf32> to vector<1x1x1xf32>
    %101 = vector.extract %100[0, 0, 0] : f32 from vector<1x1x1xf32>
    %102 = vector.broadcast %101 : f32 to vector<1x1xf32>
    %cst_86 = arith.constant 1.280000e+02 : f32
    %103 = vector.broadcast %cst_86 : f32 to vector<1x1xf32>
    %104 = arith.divf %102, %103 : vector<1x1xf32>
    %105 = arith.mulf %56#1, %56#1 : vector<2x128xf32>
    %106 = vector.shape_cast %105 : vector<2x128xf32> to vector<1x2x128xf32>
    %cst_87 = arith.constant dense<0.000000e+00> : vector<1xf32>
    %107 = vector.multi_reduction <add>, %106, %cst_87 [1, 2] : vector<1x2x128xf32> to vector<1xf32>
    %108 = vector.shape_cast %107 : vector<1xf32> to vector<1x1x1xf32>
    %109 = vector.extract %108[0, 0, 0] : f32 from vector<1x1x1xf32>
    %110 = vector.broadcast %109 : f32 to vector<1x1xf32>
    %cst_88 = arith.constant 1.280000e+02 : f32
    %111 = vector.broadcast %cst_88 : f32 to vector<1x1xf32>
    %112 = arith.divf %110, %111 : vector<1x1xf32>
    %113 = arith.mulf %104, %104 : vector<1x1xf32>
    %114 = arith.subf %112, %113 : vector<1x1xf32>
    %cst_89 = arith.constant 0.000000e+00 : f32
    %115 = vector.broadcast %cst_89 : f32 to vector<1x1xf32>
    %116 = arith.maximumf %114, %115 : vector<1x1xf32>
    %c17 = arith.constant 17 : index
    %117 = memref.load %arg7[%c17] : memref<24xf32, #tpu.memory_space<smem>>
    %cst_90 = arith.constant 9.99999974E-6 : f32
    %118 = vector.broadcast %cst_90 : f32 to vector<1x1xf32>
    %119 = arith.addf %116, %118 : vector<1x1xf32>
    %120 = math.rsqrt %119 : vector<1x1xf32>
    %121 = vector.broadcast %117 : f32 to vector<1x1xf32>
    %122 = arith.mulf %121, %120 : vector<1x1xf32>
    %c21 = arith.constant 21 : index
    %123 = memref.load %arg7[%c21] : memref<24xf32, #tpu.memory_space<smem>>
    %124 = arith.mulf %104, %122 : vector<1x1xf32>
    %125 = vector.broadcast %123 : f32 to vector<1x1xf32>
    %126 = arith.subf %125, %124 : vector<1x1xf32>
    %127 = vector.broadcast %122 : vector<1x1xf32> to vector<2x128xf32>
    %128 = arith.mulf %56#1, %127 : vector<2x128xf32>
    %129 = vector.broadcast %126 : vector<1x1xf32> to vector<2x128xf32>
    %130 = arith.addf %128, %129 : vector<2x128xf32>
    %cst_91 = arith.constant 0.000000e+00 : f32
    %131 = vector.broadcast %cst_91 : f32 to vector<2x128xf32>
    %132 = arith.maximumf %130, %131 : vector<2x128xf32>
    %133 = arith.truncf %132 : vector<2x128xf32> to vector<2x128xbf16>
    %c1_92 = arith.constant 1 : index
    %c0_93 = arith.constant 0 : index
    %c0_94 = arith.constant 0 : index
    %134 = vector.load %arg3[%c1_92, %c0_93, %c0_94] : memref<4x128x16xbf16, #tpu.memory_space<vmem>>, vector<1x128x16xbf16>
    %135 = vector.shape_cast %134 : vector<1x128x16xbf16> to vector<128x16xbf16>
    %cst_95 = arith.constant dense<0.000000e+00> : vector<2x16xf32>
    %136 = tpu.matmul %133, %135, %cst_95 {dimension_numbers = #tpu.dot_dimension_numbers<[1], [0], [0], [1], [0, 0, 1, 1], [], []>} : vector<2x128xbf16>, vector<128x16xbf16>, vector<2x16xf32> -> vector<2x16xf32>
    %137 = arith.addf %97, %136 : vector<2x16xf32>
    %138 = vector.shape_cast %56#2 : vector<2x128xf32> to vector<1x2x128xf32>
    %cst_96 = arith.constant dense<0.000000e+00> : vector<1xf32>
    %139 = vector.multi_reduction <add>, %138, %cst_96 [1, 2] : vector<1x2x128xf32> to vector<1xf32>
    %140 = vector.shape_cast %139 : vector<1xf32> to vector<1x1x1xf32>
    %141 = vector.extract %140[0, 0, 0] : f32 from vector<1x1x1xf32>
    %142 = vector.broadcast %141 : f32 to vector<1x1xf32>
    %cst_97 = arith.constant 1.280000e+02 : f32
    %143 = vector.broadcast %cst_97 : f32 to vector<1x1xf32>
    %144 = arith.divf %142, %143 : vector<1x1xf32>
    %145 = arith.mulf %56#2, %56#2 : vector<2x128xf32>
    %146 = vector.shape_cast %145 : vector<2x128xf32> to vector<1x2x128xf32>
    %cst_98 = arith.constant dense<0.000000e+00> : vector<1xf32>
    %147 = vector.multi_reduction <add>, %146, %cst_98 [1, 2] : vector<1x2x128xf32> to vector<1xf32>
    %148 = vector.shape_cast %147 : vector<1xf32> to vector<1x1x1xf32>
    %149 = vector.extract %148[0, 0, 0] : f32 from vector<1x1x1xf32>
    %150 = vector.broadcast %149 : f32 to vector<1x1xf32>
    %cst_99 = arith.constant 1.280000e+02 : f32
    %151 = vector.broadcast %cst_99 : f32 to vector<1x1xf32>
    %152 = arith.divf %150, %151 : vector<1x1xf32>
    %153 = arith.mulf %144, %144 : vector<1x1xf32>
    %154 = arith.subf %152, %153 : vector<1x1xf32>
    %cst_100 = arith.constant 0.000000e+00 : f32
    %155 = vector.broadcast %cst_100 : f32 to vector<1x1xf32>
    %156 = arith.maximumf %154, %155 : vector<1x1xf32>
    %c18 = arith.constant 18 : index
    %157 = memref.load %arg7[%c18] : memref<24xf32, #tpu.memory_space<smem>>
    %cst_101 = arith.constant 9.99999974E-6 : f32
    %158 = vector.broadcast %cst_101 : f32 to vector<1x1xf32>
    %159 = arith.addf %156, %158 : vector<1x1xf32>
    %160 = math.rsqrt %159 : vector<1x1xf32>
    %161 = vector.broadcast %157 : f32 to vector<1x1xf32>
    %162 = arith.mulf %161, %160 : vector<1x1xf32>
    %c22 = arith.constant 22 : index
    %163 = memref.load %arg7[%c22] : memref<24xf32, #tpu.memory_space<smem>>
    %164 = arith.mulf %144, %162 : vector<1x1xf32>
    %165 = vector.broadcast %163 : f32 to vector<1x1xf32>
    %166 = arith.subf %165, %164 : vector<1x1xf32>
    %167 = vector.broadcast %162 : vector<1x1xf32> to vector<2x128xf32>
    %168 = arith.mulf %56#2, %167 : vector<2x128xf32>
    %169 = vector.broadcast %166 : vector<1x1xf32> to vector<2x128xf32>
    %170 = arith.addf %168, %169 : vector<2x128xf32>
    %cst_102 = arith.constant 0.000000e+00 : f32
    %171 = vector.broadcast %cst_102 : f32 to vector<2x128xf32>
    %172 = arith.maximumf %170, %171 : vector<2x128xf32>
    %173 = arith.truncf %172 : vector<2x128xf32> to vector<2x128xbf16>
    %c2_103 = arith.constant 2 : index
    %c0_104 = arith.constant 0 : index
    %c0_105 = arith.constant 0 : index
    %174 = vector.load %arg3[%c2_103, %c0_104, %c0_105] : memref<4x128x16xbf16, #tpu.memory_space<vmem>>, vector<1x128x16xbf16>
    %175 = vector.shape_cast %174 : vector<1x128x16xbf16> to vector<128x16xbf16>
    %cst_106 = arith.constant dense<0.000000e+00> : vector<2x16xf32>
    %176 = tpu.matmul %173, %175, %cst_106 {dimension_numbers = #tpu.dot_dimension_numbers<[1], [0], [0], [1], [0, 0, 1, 1], [], []>} : vector<2x128xbf16>, vector<128x16xbf16>, vector<2x16xf32> -> vector<2x16xf32>
    %177 = arith.addf %137, %176 : vector<2x16xf32>
    %178 = vector.shape_cast %56#3 : vector<2x128xf32> to vector<1x2x128xf32>
    %cst_107 = arith.constant dense<0.000000e+00> : vector<1xf32>
    %179 = vector.multi_reduction <add>, %178, %cst_107 [1, 2] : vector<1x2x128xf32> to vector<1xf32>
    %180 = vector.shape_cast %179 : vector<1xf32> to vector<1x1x1xf32>
    %181 = vector.extract %180[0, 0, 0] : f32 from vector<1x1x1xf32>
    %182 = vector.broadcast %181 : f32 to vector<1x1xf32>
    %cst_108 = arith.constant 1.280000e+02 : f32
    %183 = vector.broadcast %cst_108 : f32 to vector<1x1xf32>
    %184 = arith.divf %182, %183 : vector<1x1xf32>
    %185 = arith.mulf %56#3, %56#3 : vector<2x128xf32>
    %186 = vector.shape_cast %185 : vector<2x128xf32> to vector<1x2x128xf32>
    %cst_109 = arith.constant dense<0.000000e+00> : vector<1xf32>
    %187 = vector.multi_reduction <add>, %186, %cst_109 [1, 2] : vector<1x2x128xf32> to vector<1xf32>
    %188 = vector.shape_cast %187 : vector<1xf32> to vector<1x1x1xf32>
    %189 = vector.extract %188[0, 0, 0] : f32 from vector<1x1x1xf32>
    %190 = vector.broadcast %189 : f32 to vector<1x1xf32>
    %cst_110 = arith.constant 1.280000e+02 : f32
    %191 = vector.broadcast %cst_110 : f32 to vector<1x1xf32>
    %192 = arith.divf %190, %191 : vector<1x1xf32>
    %193 = arith.mulf %184, %184 : vector<1x1xf32>
    %194 = arith.subf %192, %193 : vector<1x1xf32>
    %cst_111 = arith.constant 0.000000e+00 : f32
    %195 = vector.broadcast %cst_111 : f32 to vector<1x1xf32>
    %196 = arith.maximumf %194, %195 : vector<1x1xf32>
    %c19 = arith.constant 19 : index
    %197 = memref.load %arg7[%c19] : memref<24xf32, #tpu.memory_space<smem>>
    %cst_112 = arith.constant 9.99999974E-6 : f32
    %198 = vector.broadcast %cst_112 : f32 to vector<1x1xf32>
    %199 = arith.addf %196, %198 : vector<1x1xf32>
    %200 = math.rsqrt %199 : vector<1x1xf32>
    %201 = vector.broadcast %197 : f32 to vector<1x1xf32>
    %202 = arith.mulf %201, %200 : vector<1x1xf32>
    %c23 = arith.constant 23 : index
    %203 = memref.load %arg7[%c23] : memref<24xf32, #tpu.memory_space<smem>>
    %204 = arith.mulf %184, %202 : vector<1x1xf32>
    %205 = vector.broadcast %203 : f32 to vector<1x1xf32>
    %206 = arith.subf %205, %204 : vector<1x1xf32>
    %207 = vector.broadcast %202 : vector<1x1xf32> to vector<2x128xf32>
    %208 = arith.mulf %56#3, %207 : vector<2x128xf32>
    %209 = vector.broadcast %206 : vector<1x1xf32> to vector<2x128xf32>
    %210 = arith.addf %208, %209 : vector<2x128xf32>
    %cst_113 = arith.constant 0.000000e+00 : f32
    %211 = vector.broadcast %cst_113 : f32 to vector<2x128xf32>
    %212 = arith.maximumf %210, %211 : vector<2x128xf32>
    %213 = arith.truncf %212 : vector<2x128xf32> to vector<2x128xbf16>
    %c3_114 = arith.constant 3 : index
    %c0_115 = arith.constant 0 : index
    %c0_116 = arith.constant 0 : index
    %214 = vector.load %arg3[%c3_114, %c0_115, %c0_116] : memref<4x128x16xbf16, #tpu.memory_space<vmem>>, vector<1x128x16xbf16>
    %215 = vector.shape_cast %214 : vector<1x128x16xbf16> to vector<128x16xbf16>
    %cst_117 = arith.constant dense<0.000000e+00> : vector<2x16xf32>
    %216 = tpu.matmul %213, %215, %cst_117 {dimension_numbers = #tpu.dot_dimension_numbers<[1], [0], [0], [1], [0, 0, 1, 1], [], []>} : vector<2x128xbf16>, vector<128x16xbf16>, vector<2x16xf32> -> vector<2x16xf32>
    %217 = arith.addf %177, %216 : vector<2x16xf32>
    %c0_118 = arith.constant 0 : index
    %c0_119 = arith.constant 0 : index
    %218 = vector.load %arg4[%c0_118, %c0_119] : memref<1x16xf32, #tpu.memory_space<vmem>>, vector<1x16xf32>
    %219 = vector.broadcast %218 : vector<1x16xf32> to vector<2x16xf32>
    %220 = arith.addf %217, %219 : vector<2x16xf32>
    %c0_120 = arith.constant 0 : index
    %c0_121 = arith.constant 0 : index
    %221 = vector.load %arg8[%c0_120, %c0_121] : memref<2x16xf32, #tpu.memory_space<vmem>>, vector<2x16xf32>
    tpu.vector_store %arg8[%c0_120, %c0_121], %220 {strides = array<i32>} : memref<2x16xf32, #tpu.memory_space<vmem>>, vector<2x16xf32>,
    return
  }
}

</mosaic_0001>

<bundles_post_ra>
// kernel: convnet_forward.1
= control target key start
LH: loop header
LB: loop body
LE: loop exit
PB: predicated region body
PF: predicated region fallthrough
CT: control target
= control target key end

     0   :  { %13 = vsyncpa [#allocation5], 0  ;;  %s2793_s0 = inlined_call_operand.vmem [shape: f32[4,2,91], index: 0, kind: input, shape index: {}]   ;;  %s2794_s1 = inlined_call_operand.vmem [shape: f32[1,81], index: 1, kind: input, shape index: {}]   ;;  %s2795_s2 = inlined_call_operand.vmem [shape: f32[9,1,128], index: 2, kind: input, shape index: {}]   ;;  %s2796_s3 = inlined_call_operand.vmem [shape: bf16[4,128,16], index: 3, kind: input, shape index: {}]   ;;  %s2797_s4 = inlined_call_operand.vmem [shape: f32[1,16], index: 4, kind: input, shape index: {}]   ;;  %s2798_s5 = inlined_call_operand.vmem [shape: f32[72], index: 5, kind: input, shape index: {}]   ;;  %s2799_s6 = inlined_call_operand.vmem [shape: f32[288], index: 6, kind: input, shape index: {}]   ;;  %s2800_s7 = inlined_call_operand.vmem [shape: f32[24], index: 7, kind: input, shape index: {}]   ;;  %s2801_s8 = inlined_call_operand.hbm [shape: f32[2,16], index: 8, kind: output, shape index: {}]  }
   0x1   :  { %14 = vsyncpa [#allocation7], 0  ;;  %s42_s29 = sshll.u32 %s2799_s6, 4  ;;  %s43_s29 = int_to_ptr.vmem [resolvable:$true] %s42_s29 }
   0x2   :  { %15 = vsyncpa [#allocation4], 0  ;;  %s32_s10 = sshll.u32 %s2798_s5, 4  ;;  %s1965_s11 = scalar_lea.vmem %s43_s29, 48  ;;  %s33_s10 = int_to_ptr.vmem [resolvable:$true] %s32_s10 }
   0x3   :  { %p1966_p0 = scmp.ne.s32.totalorder %s43_s29, %s1965_s11  ;;  %s1969_s12 = scalar_lea.vmem %s43_s29, 64 }
   0x4   :  { %p1970_p1 = scmp.lt.s32.totalorder %s43_s29, %s43_s29  ;;  %p1971_p2 = scmp.lt.s32.totalorder %s1969_s12, %s1965_s11 }
   0x6   :  { %p1972_p3 = por %p1971_p2, %p1970_p1 }
   0x8   :  { %p1973_p4 = pnand %p1972_p3, %p1966_p0 }
   0xa   :  { %1976 = shalt.err (!%p1973_p4)
}
   0xb   :  { %s2075_s13 = smov [#allocation6]   ;;  %s1977_s14 = scalar_lea.vmem %s33_s10, 16 }
   0xc   :  { %45 = dma.vmem_to_smem %s43_s29, 48, %s2075_s13, [#allocation7]  }
   0xd   :  { %p1978_p5 = scmp.ne.s32.totalorder %s33_s10, %s1977_s14  ;;  %p1982_p6 = scmp.lt.s32.totalorder %s33_s10, %s33_s10 }
   0xe   :  { %p1983_p7 = scmp.lt.s32.totalorder %s1977_s14, %s1977_s14 }
  0x10   :  { %p1984_p8 = por %p1983_p7, %p1982_p6 }
  0x12   :  { %p1985_p9 = pnand %p1984_p8, %p1978_p5 }
  0x14   :  { %1988 = shalt.err (!%p1985_p9)
}
  0x15   :  { %s2076_s6 = smov [#allocation3]   ;;  %s52_s16 = sshll.u32 %s2800_s7, 4  ;;  %s53_s16 = int_to_ptr.vmem [resolvable:$true] %s52_s16 }
  0x16   :  { %35 = dma.vmem_to_smem %s33_s10, 16, %s2076_s6, [#allocation5]  }
  0x17   :  { %s1989_s17 = scalar_lea.vmem %s53_s16, 16  ;;  %p1994_p11 = scmp.lt.s32.totalorder %s53_s16, %s53_s16 }
  0x18   :  { %p1990_p10 = scmp.ne.s32.totalorder %s53_s16, %s1989_s17  ;;  %p1995_p12 = scmp.lt.s32.totalorder %s1989_s17, %s1989_s17 }
  0x1a   :  { %p1996_p13 = por %p1995_p12, %p1994_p11 }
  0x1c   :  { %p1997_p0 = pnand %p1996_p13, %p1990_p10 }
  0x1e   :  { %2000 = shalt.err (!%p1997_p0)
}
  0x1f   :  { %s2077_s18 = smov [#allocation8]  }
  0x20   :  { %55 = dma.vmem_to_smem %s53_s16, 16, %s2077_s18, [#allocation7]  }
  0x21   :  { %2045 = dma.done.wait [#allocation5], 16  }
  0x22   :  { %2046 = vsyncadd [#allocation5], 4294967280 }
  0x23   :  { %2047 = dma.done.wait [#allocation7], 64  }
  0x24   :  { %2048 = vsyncadd [#allocation7], 4294967232 }
  0x25   :  { %65 = sfence }
  0x26   :  { %v2160_v0 = vld [vmem:[%s2794_s1] ss:$0 sm:$0xff]  ;;  %v2170_v2 = vld [vmem:[%s2793_s0 + $0x2] sm:$0x3]  ;;  %v2175_v3 = vld [vmem:[%s2793_s0 + $0x4] sm:$0x3] }
  0x27   :  { %v2165_v1 = vld [vmem:[%s2793_s0] sm:$0x3]  ;;  %v2180_v4 = vld [vmem:[%s2793_s0 + $0x6] sm:$0x3]  ;;  %s2182_s1 = smov 0  }
  0x28 LB: > { %s2188_s28 = smul.u32 9, %s2053_s1  ;;  %s2078_s5 = smov 127   ;;  %vm306_vm0 = vcmask 656384   ;;  %vm364_vm1 = vcmask 80896   ;;  %vm366_vm2 = vcmask 744448   ;;  %vm382_vm3 = vcmask 1041408   ;;  %s2053_s1 = sphi %s2182_s1, %s80_s1  }
  0x29   : > { %s2079_s18 = smov 119   ;;  %s2080_s22 = smov 118   ;;  %vm383_vm4 = vcmask 158722  }
  0x2a   : > { %s91_s29 = sadd.s32 2, %s2188_s28  ;;  %s86_s30 = sadd.s32 1, %s2188_s28  ;;  %vm384_vm5 = vmor %vm383_vm4, %vm382_vm3 }
  0x2b   : > { %s92_s0 = sld [smem:[#allocation3 + %s91_s29]]  ;;  %s105_s9 = sadd.s32 4, %s2188_s28 }
  0x2c   : > { %s87_s10 = sld [smem:[#allocation3 + %s86_s30]]  ;;  %s100_s12 = sadd.s32 3, %s2188_s28 }
  0x2d   : > { %s106_s11 = sld [smem:[#allocation3 + %s105_s9]]  ;;  %s110_s14 = sadd.s32 5, %s2188_s28 }
  0x2e   : > { %s101_s13 = sld [smem:[#allocation3 + %s100_s12]]  ;;  %s119_s16 = sadd.s32 6, %s2188_s28 }
  0x2f   : > { %s82_s6 = sld [smem:[#allocation3 + %s2188_s28]]  ;;  %s128_s19 = sadd.s32 7, %s2188_s28 }
  0x30   : > { %s111_s15 = sld [smem:[#allocation3 + %s110_s14]]  ;;  %s137_s7 = sadd.s32 8, %s2188_s28 }
  0x31   : > { %v93_v5 = vstv %s92_s0  ;;  %s120_s17 = sld [smem:[#allocation3 + %s119_s16]]  ;;  %s340_s26 = sadd.s32 8, %s2053_s1 }
  0x32   : > { %v154_v6 = vmul.f32 %v2170_v2, %v93_v5  ;;  %v88_v7 = vstv %s87_s10  ;;  %v196_v9 = vmul.f32 %v2175_v3, %v93_v5  ;;  %v94_v10 = vmul.f32 %v93_v5, %v2165_v1  ;;  %s129_s20 = sld [smem:[#allocation3 + %s128_s19]]  ;;  %s2081_s28 = smov 10  }
  0x33   : > { %v148_v8 = vmul.f32 %v88_v7, %v2165_v1  ;;  %v2202_v11 = vstv %s106_s11  ;;  %v240_v13 = vmul.f32 %v2175_v3, %v88_v7  ;;  %v194_v14 = vmul.f32 %v2180_v4, %v88_v7  ;;  %s138_s21 = sld [smem:[#allocation3 + %s137_s7]]  ;;  %s1709_s29 = sshll.u32 %s2053_s1, 2 }
  0x34   : > { %156 = vrot.lane.b32.xlu1 %v154_v6, %s2078_s5  ;;  %v162_v12 = vmul.f32 %v2175_v3, %v2202_v11  ;;  %v2210_v15 = vstv %s101_s13  ;;  %v246_v19 = vmul.f32 %v2180_v4, %v93_v5  ;;  %v89_v20 = vmul.f32 %v2170_v2, %v88_v7  ;;  %s335_s25 = sld [smem:[#allocation8 + %s2053_s1]]  ;;  %s381_s30 = scalar_lea.vmem [#allocation2], %s1709_s29 }
  0x35   : > { %150 = vrot.lane.b32.xlu0 %v148_v8, %s2078_s5  ;;  %v2213_v16 = vstv %s82_s6  ;;  %v202_v21 = vmul.f32 %v2210_v15, %v2165_v1  ;;  %v252_v27 = vmul.f32 %v2170_v2, %v2210_v15  ;;  %v208_v28 = vmul.f32 %v2170_v2, %v2202_v11  ;;  %s341_s27 = sld [smem:[#allocation8 + %s340_s26]]  ;;  %s80_s1 = sadd.s32 1, %s2053_s1  }
  0x36   : > { %v192_v17 = vmul.f32 %v2175_v3, %v2213_v16  ;;  %v84_v18 = vmul.f32 %v2213_v16, %v2165_v1  ;;  %v112_v22 = vstv %s111_s15  ;;  %v258_v32 = vmul.f32 %v2202_v11, %v2165_v1  ;;  %p77_p1 = scmp.ge.s32.totalorder %s80_s1, 8  }
  0x37   : > { %v168_v25 = vmul.f32 %v2180_v4, %v112_v22  ;;  %v113_v26 = vmul.f32 %v2175_v3, %v112_v22  ;;  %v121_v29 = vstv %s120_s17  ;;  %v214_v33 = vmul.f32 %v112_v22, %v2165_v1 }
  0x38   : > { %198 = vrot.lane.b32.xlu1 %v196_v9, %s2078_s5  ;;  %v2225_v23 = vadd.f32 %v194_v14, %v192_v17  ;;  %v90_v24 = vadd.f32 %v89_v20, %v84_v18  ;;  %v174_v30 = vmul.f32 %v2170_v2, %v121_v29  ;;  %v122_v31 = vmul.f32 %v121_v29, %v2165_v1 }
  0x39   : > { %96 = vrot.lane.b32.xlu0 %v94_v10, %s2078_s5  ;;  %v130_v34 = vstv %s129_s20  ;;  %v264_v37 = vmul.f32 %v2170_v2, %v112_v22  ;;  %v220_v38 = vmul.f32 %v2175_v3, %v121_v29  ;;  %v139_v39 = vstv %s138_s21 }
  0x3a   : > { %v180_v35 = vmul.f32 %v130_v34, %v2165_v1  ;;  %v131_v36 = vmul.f32 %v2170_v2, %v130_v34  ;;  %v186_v40 = vmul.f32 %v2170_v2, %v139_v39  ;;  %v140_v41 = vmul.f32 %v139_v39, %v2165_v1  ;;  %v2321_v1 = vld [vmem:[%s2795_s2 + $0x5] ss:$0 sm:$0xff] (%p77_p1) }
  0x3b   : > { %v270_v42 = vmul.f32 %v2180_v4, %v121_v29  ;;  %v226_v43 = vmul.f32 %v2180_v4, %v130_v34  ;;  %v276_v44 = vmul.f32 %v2175_v3, %v130_v34  ;;  %v232_v45 = vmul.f32 %v2175_v3, %v139_v39 }
  0x3c   : > { %164 = vrot.lane.b32.xlu1 %v162_v12, %s2078_s5  ;;  %v282_v46 = vmul.f32 %v2180_v4, %v139_v39  ;;  %v146_v47 = vmul.f32 %v2170_v2, %v2213_v16  ;;  %v160_v51 = vmul.f32 %v2180_v4, %v2210_v15  ;;  %v103_v54 = vmul.f32 %v2175_v3, %v2210_v15  ;;  %v2326_v2 = vld [vmem:[%s2795_s2 + $0x6] ss:$0 sm:$0xff] (%p77_p1)  ;;  %v2331_v3 = vld [vmem:[%s2795_s2 + $0x7] ss:$0 sm:$0xff] (%p77_p1) }
  0x3d   : > { %242 = vrot.lane.b32.xlu0 %v240_v13, %s2078_s5  ;;  %v108_v58 = vmul.f32 %v2180_v4, %v2202_v11  ;;  %v238_v18 = vmul.f32 %v2180_v4, %v2213_v16  ;;  %v2336_v4 = vld [vmem:[%s2795_s2 + $0x8] ss:$0 sm:$0xff] (%p77_p1) }
  0x40   : > { %248 = vrot.lane.b32.xlu1 %v246_v19, %s2078_s5 }
  0x41   : > { %204 = vrot.lane.b32.xlu0 %v202_v21, %s2079_s18 }
  0x44   : > { %170 = vrot.lane.b32.xlu1 %v168_v25, %s2078_s5 }
  0x45   : > { %115 = vrot.lane.b32.xlu0 %v113_v26, %s2078_s5 }
  0x48   : > { %254 = vrot.lane.b32.xlu1 %v252_v27, %s2079_s18 }
  0x49   : > { %210 = vrot.lane.b32.xlu0 %v208_v28, %s2079_s18 }
  0x4c   : > { %176 = vrot.lane.b32.xlu1 %v174_v30, %s2079_s18 }
  0x4d   : > { %124 = vrot.lane.b32.xlu0 %v122_v31, %s2079_s18 }
  0x50   : > { %260 = vrot.lane.b32.xlu1 %v258_v32, %s2080_s22 }
  0x51   : > { %216 = vrot.lane.b32.xlu0 %v214_v33, %s2080_s22 }
  0x54   : > { %182 = vrot.lane.b32.xlu1 %v180_v35, %s2080_s22 }
  0x55   : > { %133 = vrot.lane.b32.xlu0 %v131_v36, %s2079_s18 }
  0x58   : > { %266 = vrot.lane.b32.xlu1 %v264_v37, %s2080_s22 }
  0x59   : > { %222 = vrot.lane.b32.xlu0 %v220_v38, %s2079_s18 }
  0x5c   : > { %188 = vrot.lane.b32.xlu1 %v186_v40, %s2080_s22 }
  0x5d   : > { %142 = vrot.lane.b32.xlu0 %v140_v41, %s2080_s22 }
  0x60   : > { %272 = vrot.lane.b32.xlu1 %v270_v42, %s2079_s18 }
  0x61   : > { %228 = vrot.lane.b32.xlu0 %v226_v43, %s2079_s18 }
  0x64   : > { %278 = vrot.lane.b32.xlu1 %v276_v44, %s2080_s22 }
  0x65   : > { %234 = vrot.lane.b32.xlu0 %v232_v45, %s2080_s22 }
  0x69   : > { %284 = vrot.lane.b32.xlu0 %v282_v46, %s2080_s22  ;;  %s2346_s22 = smov (%p77_p1), 0  }
  0xa6   : > { %v157_v48 = vpop.permute.xlu1 %156 }
  0xa7   : > { %v151_v49 = vpop.permute.xlu0 %150 }
  0xa8   : > { %v153_v50 = vadd.f32 %v151_v49, %v146_v47 }
  0xaa   : > { %v159_v52 = vadd.f32 %v157_v48, %v153_v50  ;;  %v199_v53 = vpop.permute.xlu1 %198 }
  0xab   : > { %v97_v55 = vpop.permute.xlu0 %96  ;;  %v201_v20 = vadd.f32 %v199_v53, %v2225_v23 }
  0xac   : > { %v99_v56 = vadd.f32 %v97_v55, %v90_v24  ;;  %v161_v57 = vadd.f32 %v160_v51, %v159_v52 }
  0xae   : > { %v104_v59 = vadd.f32 %v103_v54, %v99_v56  ;;  %v165_v60 = vpop.permute.xlu1 %164 }
  0xaf   : > { %v243_v61 = vpop.permute.xlu0 %242  ;;  %v167_v21 = vadd.f32 %v165_v60, %v161_v57 }
  0xb0   : > { %v109_v62 = vadd.f32 %v108_v58, %v104_v59  ;;  %v245_v22 = vadd.f32 %v243_v61, %v238_v18 }
  0xb2   : > { %v249_v63 = vpop.permute.xlu1 %248 }
  0xb3   : > { %v205_v5 = vpop.permute.xlu0 %204  ;;  %v251_v29 = vadd.f32 %v249_v63, %v245_v22 }
  0xb4   : > { %v207_v24 = vadd.f32 %v205_v5, %v201_v20 }
  0xb6   : > { %v171_v6 = vpop.permute.xlu1 %170 }
  0xb7   : > { %v116_v7 = vpop.permute.xlu0 %115  ;;  %v173_v25 = vadd.f32 %v171_v6, %v167_v21 }
  0xb8   : > { %v118_v26 = vadd.f32 %v116_v7, %v109_v62 }
  0xba   : > { %v255_v8 = vpop.permute.xlu1 %254 }
  0xbb   : > { %v211_v9 = vpop.permute.xlu0 %210  ;;  %v257_v33 = vadd.f32 %v255_v8, %v251_v29  ;;  %v338_v29 = vstv %s335_s25 }
  0xbc   : > { %v213_v30 = vadd.f32 %v211_v9, %v207_v24 }
  0xbe   : > { %v177_v10 = vpop.permute.xlu1 %176 }
  0xbf   : > { %v125_v12 = vpop.permute.xlu0 %124  ;;  %v179_v31 = vadd.f32 %v177_v10, %v173_v25 }
  0xc0   : > { %v127_v32 = vadd.f32 %v125_v12, %v118_v26 }
  0xc2   : > { %v261_v13 = vpop.permute.xlu1 %260 }
  0xc3   : > { %v217_v14 = vpop.permute.xlu0 %216  ;;  %v263_v38 = vadd.f32 %v261_v13, %v257_v33 }
  0xc4   : > { %v219_v34 = vadd.f32 %v217_v14, %v213_v30 }
  0xc6   : > { %v183_v15 = vpop.permute.xlu1 %182 }
  0xc7   : > { %v134_v17 = vpop.permute.xlu0 %133  ;;  %v185_v35 = vadd.f32 %v183_v15, %v179_v31 }
  0xc8   : > { %v136_v36 = vadd.f32 %v134_v17, %v127_v32  ;;  %v343_v32 = vstv %s341_s27 }
  0xca   : > { %v267_v11 = vpop.permute.xlu1 %266 }
  0xcb   : > { %v223_v19 = vpop.permute.xlu0 %222  ;;  %v269_v41 = vadd.f32 %v267_v11, %v263_v38 }
  0xcc   : > { %v225_v39 = vadd.f32 %v223_v19, %v219_v34 }
  0xce   : > { %v189_v27 = vpop.permute.xlu1 %188 }
  0xcf   : > { %v143_v28 = vpop.permute.xlu0 %142  ;;  %v2274_v23 = vadd.f32 %v189_v27, %v185_v35 }
  0xd0   : > { %v145_v40 = vadd.f32 %v143_v28, %v136_v36 }
  0xd1   : > { %v299_v45 = vmul.f32 %v2274_v23, %v2274_v23 }
  0xd2   : > { %v273_v16 = vpop.permute.xlu1 %272  ;;  %v298_v46 = vmul.f32 %v145_v40, %v145_v40  ;;  %v288_v49 = vadd.f32 %v2274_v23, %v145_v40 }
  0xd3   : > { %v229_v37 = vpop.permute.xlu0 %228  ;;  %v275_v47 = vadd.f32 %v273_v16, %v269_v41 }
  0xd4   : > { %v231_v42 = vadd.f32 %v229_v37, %v225_v39  ;;  %v300_v55 = vadd.f32 %v299_v45, %v298_v46 }
  0xd6   : > { %v279_v43 = vpop.permute.xlu1 %278 }
  0xd7   : > { %v235_v44 = vpop.permute.xlu0 %234  ;;  %v281_v50 = vadd.f32 %v279_v43, %v275_v47 }
  0xd8   : > { %v237_v48 = vadd.f32 %v235_v44, %v231_v42 }
  0xda   : > { %v301_v51 = vmul.f32 %v237_v48, %v237_v48  ;;  %v289_v54 = vadd.f32 %v288_v49, %v237_v48 }
  0xdb   : > { %v285_v52 = vpop.permute.xlu0 %284 }
  0xdc   : > { %v287_v53 = vadd.f32 %v285_v52, %v281_v50  ;;  %v302_v57 = vadd.f32 %v301_v51, %v300_v55  ;;  %v374_v52 = vlaneseq }
  0xde   : > { %v290_v56 = vadd.f32 %v289_v54, %v287_v53  ;;  %v303_v58 = vmul.f32 %v287_v53, %v287_v53 }
  0xe0   : > { %v297_v59 = vmul.f32 %v2160_v0, %v290_v56  ;;  %v304_v60 = vadd.f32 %v303_v58, %v302_v57  ;;  %v2083_v57 = vmov 0.0  }
  0xe2   : > { %v307_v61 = vsel %vm306_vm0, %v297_v59, 0.0  ;;  %v305_v62 = vmul.f32 %v2160_v0, %v304_v60  ;;  %v2296_v60 = vld [vmem:[%s2795_s2] ss:$0 sm:$0xff] (%p77_p1)  ;;  %v2316_v0 = vld [vmem:[%s2795_s2 + $0x4] ss:$0 sm:$0xff] (%p77_p1) }
  0xe3   : > { %308 = vadd.xlane.f32.xlu1 %v307_v61  ;;  %v2301_v61 = vld [vmem:[%s2795_s2 + $0x1] ss:$0 sm:$0xff] (%p77_p1) }
  0xe4   : > { %v320_v63 = vsel %vm306_vm0, %v305_v62, 0.0  ;;  %v2306_v62 = vld [vmem:[%s2795_s2 + $0x2] ss:$0 sm:$0xff] (%p77_p1) }
  0xe5   : > { %321 = vadd.xlane.f32.xlu0 %v320_v63  ;;  %v2311_v63 = vld [vmem:[%s2795_s2 + $0x3] ss:$0 sm:$0xff] (%p77_p1) }
 0x16c   : > { %v309_v5 = vpop.xlane.xlu1 %308 }
 0x16d   : > { %v310_v6 = vrot.slane %v309_v5, 4 }
 0x16e   : > { %v322_v7 = vpop.xlane.xlu0 %321 }
 0x16f   : > { %v311_v8 = vadd.f32 %v310_v6, %v309_v5  ;;  %v323_v9 = vrot.slane %v322_v7, 4  ;;  %v2338_v5 = vmov (%p77_p1), 0.0   ;;  %v2340_v6 = vmov (%p77_p1), 0.0  }
 0x171   : > { %v312_v10 = vrot.slane %v311_v8, 2  ;;  %v324_v12 = vadd.f32 %v323_v9, %v322_v7  ;;  %v2342_v7 = vmov (%p77_p1), 0.0  }
 0x173   : > { %v325_v13 = vrot.slane %v324_v12, 2  ;;  %v313_v14 = vadd.f32 %v312_v10, %v311_v8  ;;  %v2344_v8 = vmov (%p77_p1), 0.0  }
 0x175   : > { %v314_v15 = vrot.slane %v313_v14, 1  ;;  %v326_v17 = vadd.f32 %v325_v13, %v324_v12 }
 0x177   : > { %v315_v18 = vadd.f32 %v314_v15, %v313_v14  ;;  %v327_v11 = vrot.slane %v326_v17, 1 }
 0x179   : > { %1827 = vpush %v315_v18  ;;  %v328_v19 = vadd.f32 %v327_v11, %v326_v17 }
 0x17b   : > { %1829 = vpush %v328_v19 }
 0x1aa   : > { %s1828_s23 = spop %1827 }
 0x1ab   : > { %v317_v20 = vstv %s1828_s23 }
 0x1ac   : > { %v319_v21 = vmul.f32 0.001953125, %v317_v20  ;;  %s1830_s24 = spop %1829 }
 0x1ad   : > { %v330_v22 = vstv %s1830_s24 }
 0x1ae   : > { %v332_v24 = vmul.f32 %v319_v21, %v319_v21  ;;  %v331_v25 = vmul.f32 0.001953125, %v330_v22 }
 0x1b0   : > { %v333_v26 = vsub.f32 %v331_v25, %v332_v24 }
 0x1b2   : > { %v334_v27 = vmax.f32 %v333_v26, 0.0 }
 0x1b4   : > { %v336_v28 = vadd.f32 1e-05, %v334_v27 }
 0x1b6   : > { %1923 = vrsqrt.f32 %v336_v28 }
 0x1c3   : > { %v1924_v30 = vpop.eup %1923 }
 0x1c4   : > { %v339_v31 = vmul.f32 %v1924_v30, %v338_v29 }
 0x1c6   : > { %v342_v33 = vmul.f32 %v339_v31, %v319_v21  ;;  %v345_v34 = vmul.f32 %v339_v31, %v145_v40  ;;  %v348_v36 = vmul.f32 %v339_v31, %v2274_v23  ;;  %v351_v16 = vmul.f32 %v339_v31, %v237_v48 }
 0x1c7   : > { %v354_v37 = vmul.f32 %v339_v31, %v287_v53  ;;  %v2082_v40 = vmov 1983009808   ;;  %v375_v48 = vshrl.u32 %v374_v52, 7 }
 0x1c8   : > { %v344_v35 = vsub.f32 %v343_v32, %v342_v33  ;;  %v372_v51 = vunpack.c.l.s4 %v2082_v40 }
 0x1ca   : > { %v346_v38 = vadd.f32 %v345_v34, %v344_v35  ;;  %v349_v39 = vadd.f32 %v348_v36, %v344_v35  ;;  %v352_v41 = vadd.f32 %v351_v16, %v344_v35  ;;  %v355_v42 = vadd.f32 %v354_v37, %v344_v35 }
 0x1cb   : > { %v373_v23 = vunpack.c.0.s8 %v372_v51 }
 0x1cc   : > { %v347_v43 = vmax.f32 %v346_v38, 0.0  ;;  %v350_v44 = vmax.f32 %v349_v39, 0.0  ;;  %v353_v45 = vmax.f32 %v352_v41, 0.0  ;;  %v356_v46 = vmax.f32 %v355_v42, 0.0 }
 0x1cd   : > { %v2284_v54 = vsub.s32 %v373_v23, %v375_v48 }
 0x1ce   : > { %v357_v47 = vmax.f32 %v347_v43, %v350_v44  ;;  %v358_v49 = vmax.f32 %v353_v45, %v356_v46 }
 0x1d0   : > { %v359_v50 = vmax.f32 %v357_v47, %v358_v49 }
 0x1d2   : > { %361 = vrot.lane.b32.xlu0 %v359_v50, %s2081_s28 }
 0x244   : > { %v362_v53 = vpop.permute.xlu0 %361 }
 0x245   : > { %v365_v55 = vsel %vm364_vm1, 0.0, %v362_v53 }
 0x246   : > { %v367_v56 = vsel %vm366_vm2, %v365_v55, 0.0 }
 0x247   : > { %v370_v58 = vcombine.low %v367_v56, %v2083_v57  ;;  %79 = sbr.rel (!%p77_p1) target bundleno = 40 (0x28), region = 94 }
 0x249   : > { %v377_v59 = vrot.slane %v370_v58, %v2284_v54 }
 0x24b   : > { %385 = vst.msk [vmem:[%s381_s30] sm:$0xf] %vm384_vm5, %v377_v59 }
 0x24c LB: > { %v455_v9 = vrot.slane %v2301_v61, %v2284_v54  ;;  %v583_v10 = vrot.slane %v2311_v63, %v2284_v54  ;;  %s2084_s2 = smov 1   ;;  %v519_v12 = vrot.slane %v2306_v62, %v2284_v54  ;;  %s2085_s23 = smov 9   ;;  %v647_v13 = vrot.slane %v2316_v0, %v2284_v54  ;;  %s2073_s22 = sphi %s2346_s22, %s408_s22   ;;  %v2069_v8 = vphi %v2344_v8, %v2809_v8   ;;  %v2065_v7 = vphi %v2342_v7, %v2808_v7   ;;  %v2061_v6 = vphi %v2340_v6, %v2807_v6   ;;  %v2057_v5 = vphi %v2338_v5, %v2806_v5  }
 0x24d   : > { %s2086_s24 = smov 2   ;;  %s2087_s25 = smov 10   ;;  %v711_v14 = vrot.slane %v2321_v1, %v2284_v54  ;;  %v775_v15 = vrot.slane %v2326_v2, %v2284_v54  ;;  %v839_v17 = vrot.slane %v2331_v3, %v2284_v54  ;;  %v903_v18 = vrot.slane %v2336_v4, %v2284_v54 }
 0x24e   : > { %456 = vrot.lane.b32.xlu0 %v455_v9, %s2084_s2  ;;  %584 = vrot.lane.b32.xlu1 %v583_v10, %s2085_s23  ;;  %s2088_s26 = smov 11   ;;  %s2089_s27 = smov 18   ;;  %vm459_vm6 = vcmask 7168   ;;  %vm523_vm7 = vcmask 15360   ;;  %vm587_vm8 = vcmask 72704   ;;  %vm715_vm9 = vcmask 89088  }
 0x24f   : > { %s2090_s28 = smov 19   ;;  %s2091_s29 = smov 20   ;;  %vm779_vm10 = vcmask 146432   ;;  %vm843_vm11 = vcmask 154624   ;;  %vm907_vm12 = vcmask 162816   ;;  %vm471_vm13 = vcmask 1039360  }
 0x250   : > { %s2380_s30 = smul.u32 9, %s2073_s22  ;;  %s1710_s10 = sshll.u32 %s2073_s22, 2  ;;  %vm535_vm14 = vcmask 1031168   ;;  %vm599_vm15 = vcmask 973824   ;;  %vm663_vm0 = vcmask 965632   ;;  %vm727_vm2 = vcmask 957440  }
 0x251   : > { %s415_s16 = scalar_lea.vmem [#allocation2], %s1710_s10  ;;  %s2092_s23 = smov 127   ;;  %vm791_vm4 = vcmask 900096   ;;  %vm855_vm5 = vcmask 891904  }
 0x252   : > { %520 = vrot.lane.b32.xlu0 %v519_v12, %s2086_s24  ;;  %648 = vrot.lane.b32.xlu1 %v647_v13, %s2087_s25  ;;  %s475_s0 = sadd.s32 73, %s2380_s30  ;;  %s463_s9 = sadd.s32 1, %s2380_s30  ;;  %v2393_v19 = vld [vmem:[%s415_s16] sm:$0xf] }
 0x253   : > { %s476_s11 = sld [smem:[#allocation6 + %s475_s0]]  ;;  %s497_s13 = sadd.s32 217, %s2380_s30 }
 0x254   : > { %s464_s12 = sld [smem:[#allocation6 + %s463_s9]]  ;;  %s486_s14 = sadd.s32 145, %s2380_s30 }
 0x255   : > { %s2387_s6 = sld [smem:[#allocation6 + %s497_s13]]  ;;  %s539_s5 = sadd.s32 74, %s2380_s30 }
 0x256   : > { %712 = vrot.lane.b32.xlu0 %v711_v14, %s2088_s26  ;;  %776 = vrot.lane.b32.xlu1 %v775_v15, %s2089_s27  ;;  %s2389_s1 = sld [smem:[#allocation6 + %s486_s14]]  ;;  %s527_s15 = sadd.s32 2, %s2380_s30 }
 0x257   : > { %s2395_s17 = sld [smem:[#allocation6 + %s539_s5]]  ;;  %s561_s19 = sadd.s32 218, %s2380_s30 }
 0x258   : > { %s2397_s18 = sld [smem:[#allocation6 + %s527_s15]]  ;;  %s550_s20 = sadd.s32 146, %s2380_s30 }
 0x259   : > { %v477_v22 = vstv %s476_s11  ;;  %s2402_s7 = sld [smem:[#allocation6 + %s561_s19]]  ;;  %s603_s2 = sadd.s32 75, %s2380_s30 }
 0x25a   : > { %840 = vrot.lane.b32.xlu0 %v839_v17, %s2090_s28  ;;  %904 = vrot.lane.b32.xlu1 %v903_v18, %s2091_s29  ;;  %v465_v24 = vstv %s464_s12  ;;  %s2406_s21 = sld [smem:[#allocation6 + %s550_s20]]  ;;  %s591_s24 = sadd.s32 3, %s2380_s30 }
 0x25b   : > { %v499_v31 = vstv %s2387_s6  ;;  %s2411_s25 = sld [smem:[#allocation6 + %s603_s2]]  ;;  %s625_s27 = sadd.s32 219, %s2380_s30 }
 0x25c   : > { %v488_v32 = vstv %s2389_s1  ;;  %s2415_s26 = sld [smem:[#allocation6 + %s591_s24]]  ;;  %s614_s28 = sadd.s32 147, %s2380_s30 }
 0x25d   : > { %v541_v37 = vstv %s2395_s17  ;;  %s2419_s29 = sld [smem:[#allocation6 + %s625_s27]]  ;;  %s667_s9 = sadd.s32 76, %s2380_s30 }
 0x25e   : > { %v529_v38 = vstv %s2397_s18  ;;  %s2423_s0 = sld [smem:[#allocation6 + %s614_s28]]  ;;  %s2093_s10 = smov 126  }
 0x25f   : > { %v563_v43 = vstv %s2402_s7  ;;  %s655_s11 = sadd.s32 4, %s2380_s30  ;;  %s2428_s12 = sld [smem:[#allocation6 + %s667_s9]] }
 0x260   : > { %v552_v44 = vstv %s2406_s21  ;;  %s2432_s13 = sld [smem:[#allocation6 + %s655_s11]]  ;;  %s689_s14 = sadd.s32 220, %s2380_s30 }
 0x261   : > { %v605_v40 = vstv %s2411_s25  ;;  %s678_s6 = sadd.s32 148, %s2380_s30  ;;  %s2436_s1 = sld [smem:[#allocation6 + %s689_s14]] }
 0x262   : > { %v593_v51 = vstv %s2415_s26  ;;  %s2441_s5 = sld [smem:[#allocation6 + %s678_s6]]  ;;  %s731_s15 = sadd.s32 77, %s2380_s30 }
 0x263   : > { %v627_v53 = vstv %s2419_s29  ;;  %s2094_s16 = smov 119   ;;  %s719_s17 = sadd.s32 5, %s2380_s30 }
 0x264   : > { %v616_v55 = vstv %s2423_s0  ;;  %s2446_s18 = sld [smem:[#allocation6 + %s731_s15]]  ;;  %s753_s20 = sadd.s32 221, %s2380_s30 }
 0x265   : > { %v669_v10 = vstv %s2428_s12  ;;  %s2450_s19 = sld [smem:[#allocation6 + %s719_s17]]  ;;  %s742_s7 = sadd.s32 149, %s2380_s30 }
 0x266   : > { %v657_v12 = vstv %s2432_s13  ;;  %s2454_s21 = sld [smem:[#allocation6 + %s753_s20]]  ;;  %s2095_s24 = smov 118  }
 0x267   : > { %v691_v17 = vstv %s2436_s1  ;;  %s2458_s2 = sld [smem:[#allocation6 + %s742_s7]]  ;;  %s783_s25 = sadd.s32 6, %s2380_s30 }
 0x268   : > { %v680_v18 = vstv %s2441_s5  ;;  %s2467_s27 = sld [smem:[#allocation6 + %s783_s25]]  ;;  %s817_s28 = sadd.s32 222, %s2380_s30 }
 0x269   : > { %s806_s29 = sadd.s32 150, %s2380_s30  ;;  %s2471_s0 = sld [smem:[#allocation6 + %s817_s28]] }
 0x26a   : > { %s2475_s9 = sld [smem:[#allocation6 + %s806_s29]]  ;;  %s2096_s11 = smov 117  }
 0x26b   : > { %s847_s12 = sadd.s32 7, %s2380_s30  ;;  %s881_s6 = sadd.s32 223, %s2380_s30 }
 0x26c   : > { %s2484_s14 = sld [smem:[#allocation6 + %s847_s12]]  ;;  %s870_s1 = sadd.s32 151, %s2380_s30 }
 0x26d   : > { %s2488_s5 = sld [smem:[#allocation6 + %s881_s6]]  ;;  %s2097_s17 = smov 110  }
 0x26e   : > { %s2492_s15 = sld [smem:[#allocation6 + %s870_s1]]  ;;  %s945_s7 = sadd.s32 224, %s2380_s30 }
 0x26f   : > { %s2099_s25 = smov 108   ;;  %s434_s29 = sadd.s32 144, %s2380_s30 }
 0x270   : > { %s408_s22 = sadd.s32 1, %s2073_s22  }
 0x271   : > { %p405_p2 = scmp.ge.s32.totalorder %s408_s22, 8  }
 0x272   :  { %v1925_v1 = vld [vmem:[%s2796_s3 + $0x38] sm:$0xff] (%p405_p2)   ;;  %v2100_v2 = vmov (%p405_p2), 0.0   ;;  %v1927_v4 = vld [vmem:[%s2796_s3 + $0x30] sm:$0xff] (%p405_p2)   ;;  %s1683_s22 = sld [smem:[#allocation8 + $0x17]] (%p405_p2) }
 0x273   :  { %1767 = vmatprep.subr.bf16.mxu1 (%p405_p2), %v2100_v2  ;;  %1747 = vmatprep.subr.bf16.mxu0 (%p405_p2), %v2100_v2  ;;  %v1926_v3 = vld [vmem:[%s2796_s3 + $0x78] sm:$0xff] (%p405_p2)  }
 0x274   :  { %1768 = vmatpush3.bf16.msra.mxu1 (%p405_p2), %v1925_v1  ;;  %1748 = vmatpush3.bf16.msra.mxu0 (%p405_p2), %v1926_v3 }
 0x275   :  { %1769 = vmatprep.subr.bf16.mxu1 (%p405_p2), %v2100_v2  ;;  %1749 = vmatprep.subr.bf16.mxu0 (%p405_p2), %v2100_v2 }
 0x278   :  { %1770 = vmatpush3.bf16.msra.mxu1 (%p405_p2), %v1927_v4 }
 0x279   :  { %1771 = vmatprep.subr.bf16.mxu1 (%p405_p2), %v2100_v2 }
 0x2c0   : > { %v457_v11 = vpop.permute.xlu0 %456  ;;  %v585_v33 = vpop.permute.xlu1 %584 }
 0x2c1   : > { %v458_v20 = vrot.slane %v457_v11, 6  ;;  %v586_v16 = vrot.slane %v585_v33, 6 }
 0x2c3   : > { %v460_v21 = vsel %vm459_vm6, %v458_v20, %v457_v11  ;;  %v588_v42 = vsel %vm587_vm8, %v586_v16, %v585_v33  ;;  %vm919_vm6 = vcmask 883712  }
 0x2c4   : > { %v462_v25 = vmul.f32 %v460_v21, %v2393_v19  ;;  %v521_v26 = vpop.permute.xlu0 %520  ;;  %v649_v45 = vpop.permute.xlu1 %648  ;;  %v590_v46 = vmul.f32 %v588_v42, %v2393_v19  ;;  %v819_v42 = vstv %s2471_s0  ;;  %s425_s0 = sld [smem:[#allocation6 + %s2380_s30]] }
 0x2c5   : > { %v522_v27 = vrot.slane %v521_v26, 6  ;;  %v650_v50 = vrot.slane %v649_v45, 6 }
 0x2c6   : > { %v478_v28 = vmul.f32 %v477_v22, %v462_v25  ;;  %v466_v29 = vmul.f32 %v465_v24, %v462_v25  ;;  %v500_v35 = vmul.f32 %v499_v31, %v462_v25  ;;  %v489_v36 = vmul.f32 %v488_v32, %v462_v25 }
 0x2c7   : > { %v524_v30 = vsel %vm523_vm7, %v522_v27, %v521_v26  ;;  %v606_v52 = vmul.f32 %v605_v40, %v590_v46  ;;  %v594_v23 = vmul.f32 %v593_v51, %v590_v46  ;;  %v652_v48 = vsel %vm364_vm1, %v650_v50, %v649_v45 }
 0x2c8   : > { %480 = vrot.lane.b32.xlu1 %v478_v28, %s2092_s23  ;;  %468 = vrot.lane.b32.xlu0 %v466_v29, %s2092_s23  ;;  %v526_v34 = vmul.f32 %v524_v30, %v2393_v19  ;;  %v713_v56 = vpop.permute.xlu0 %712  ;;  %v654_v57 = vmul.f32 %v652_v48, %v2393_v19  ;;  %v628_v58 = vmul.f32 %v627_v53, %v590_v46  ;;  %v777_v11 = vpop.permute.xlu1 %776  ;;  %v733_v25 = vstv %s2446_s18  ;;  %s911_s18 = sadd.s32 8, %s2380_s30 }
 0x2c9   : > { %v617_v59 = vmul.f32 %v616_v55, %v590_v46  ;;  %v714_v9 = vrot.slane %v713_v56, 6  ;;  %v778_v24 = vrot.slane %v777_v11, 6  ;;  %v721_v26 = vstv %s2450_s19  ;;  %s912_s20 = sld [smem:[#allocation6 + %s911_s18]] }
 0x2ca   : > { %v542_v39 = vmul.f32 %v541_v37, %v526_v34  ;;  %v530_v41 = vmul.f32 %v529_v38, %v526_v34  ;;  %v564_v47 = vmul.f32 %v563_v43, %v526_v34  ;;  %v553_v49 = vmul.f32 %v552_v44, %v526_v34  ;;  %s1620_s18 = sld [smem:[#allocation8 + $0x10]] (%p405_p2) }
 0x2cb   : > { %v670_v13 = vmul.f32 %v669_v10, %v654_v57  ;;  %v658_v14 = vmul.f32 %v657_v12, %v654_v57  ;;  %v716_v15 = vsel %vm715_vm9, %v714_v9, %v713_v56  ;;  %v692_v21 = vmul.f32 %v691_v17, %v654_v57 }
 0x2cc   : > { %502 = vrot.lane.b32.xlu1 %v500_v35, %s2092_s23  ;;  %491 = vrot.lane.b32.xlu0 %v489_v36, %s2092_s23  ;;  %s795_s23 = sadd.s32 78, %s2380_s30  ;;  %v718_v20 = vmul.f32 %v716_v15, %v2393_v19  ;;  %v681_v22 = vmul.f32 %v680_v18, %v654_v57  ;;  %v780_v29 = vsel %vm779_vm10, %v778_v24, %v777_v11  ;;  %v755_v30 = vstv %s2454_s21  ;;  %v841_v32 = vpop.permute.xlu0 %840  ;;  %v905_v44 = vpop.permute.xlu1 %904  ;;  %s934_s21 = sadd.s32 152, %s2380_s30 }
 0x2cd   : > { %s2463_s26 = sld [smem:[#allocation6 + %s795_s23]]  ;;  %v744_v31 = vstv %s2458_s2  ;;  %v782_v33 = vmul.f32 %v780_v29, %v2393_v19  ;;  %v842_v36 = vrot.slane %v841_v32, 6  ;;  %v785_v37 = vstv %s2467_s27  ;;  %s439_s27 = sadd.s32 216, %s2380_s30 }
 0x2ce   : > { %v734_v27 = vmul.f32 %v733_v25, %v718_v20  ;;  %v722_v28 = vmul.f32 %v721_v26, %v718_v20  ;;  %v756_v34 = vmul.f32 %v755_v30, %v718_v20  ;;  %v745_v35 = vmul.f32 %v744_v31, %v718_v20  ;;  %s946_s2 = sld [smem:[#allocation6 + %s945_s7]] }
 0x2cf   : > { %v808_v43 = vstv %s2475_s9  ;;  %v820_v46 = vmul.f32 %v819_v42, %v782_v33  ;;  %v849_v40 = vstv %s2484_s14  ;;  %v883_v48 = vstv %s2488_s5  ;;  %s935_s23 = sld [smem:[#allocation6 + %s934_s21]] }
 0x2d0   : > { %544 = vrot.lane.b32.xlu1 %v542_v39, %s2093_s10  ;;  %532 = vrot.lane.b32.xlu0 %v530_v41, %s2093_s10  ;;  %v786_v39 = vmul.f32 %v785_v37, %v782_v33  ;;  %v844_v41 = vsel %vm843_vm11, %v842_v36, %v841_v32  ;;  %v872_v53 = vstv %s2492_s15  ;;  %s440_s9 = sld [smem:[#allocation6 + %s439_s27]]  ;;  %v426_v36 = vstv %s425_s0  ;;  %s2102_s0 = smov (%p405_p2), [#allocation9]  }
 0x2d1   : > { %v846_v45 = vmul.f32 %v844_v41, %v2393_v19  ;;  %vm2101_vm1 = vmmov (%p405_p2), 0   ;;  %s1623_s7 = sld [smem:[#allocation8 + $0x15]] (%p405_p2) }
 0x2d2   :  { %1783 = vmatprep.mubr.msk.bf16.mxu1 (%p405_p2), %vm2101_vm1, %v2100_v2  ;;  %1763 = vmatprep.mubr.msk.bf16.mxu0 (%p405_p2), %vm2101_vm1, %v2100_v2 }
 0x2d3   : > { %v797_v16 = vstv %s2463_s26  ;;  %v884_v56 = vmul.f32 %v883_v48, %v846_v45  ;;  %v873_v57 = vmul.f32 %v872_v53, %v846_v45  ;;  %s429_s26 = sadd.s32 72, %s2380_s30 }
 0x2d4   : > { %566 = vrot.lane.b32.xlu1 %v564_v47, %s2093_s10  ;;  %555 = vrot.lane.b32.xlu0 %v553_v49, %s2093_s10  ;;  %s859_s10 = sadd.s32 79, %s2380_s30  ;;  %v798_v38 = vmul.f32 %v797_v16, %v782_v33  ;;  %v809_v47 = vmul.f32 %v808_v43, %v782_v33  ;;  %v906_v49 = vrot.slane %v905_v44, 6  ;;  %v947_v12 = vstv %s946_s2  ;;  %s430_s28 = sld [smem:[#allocation6 + %s429_s26]] }
 0x2d5   : > { %s2480_s13 = sld [smem:[#allocation6 + %s859_s10]] }
 0x2d6   : > { %s435_s10 = sld [smem:[#allocation6 + %s434_s29]]  ;;  %v441_v16 = vstv %s440_s9  ;;  %s1559_s9 = sshll.u32 (%p405_p2), %s2102_s0, 4  ;;  %s1560_s9 = int_to_ptr.vmem [resolvable:$true] %s1559_s9 }
 0x2d7   :  { %p2006_p4 = scmp.lt.s32.totalorder (%p405_p2), %s1560_s9, %s1560_s9 }
 0x2d8   : > { %608 = vrot.lane.b32.xlu1 %v606_v52, %s2094_s16  ;;  %596 = vrot.lane.b32.xlu0 %v594_v23, %s2094_s16  ;;  %v850_v52 = vmul.f32 %v849_v40, %v846_v45  ;;  %v908_v23 = vsel %vm907_vm12, %v906_v49, %v905_v44 }
 0x2d9   : > { %v910_v55 = vmul.f32 %v908_v23, %v2393_v19 }
 0x2db   : > { %v861_v50 = vstv %s2480_s13 }
 0x2dc   : > { %630 = vrot.lane.b32.xlu1 %v628_v58, %s2094_s16  ;;  %619 = vrot.lane.b32.xlu0 %v617_v59, %s2094_s16  ;;  %s923_s16 = sadd.s32 80, %s2380_s30  ;;  %v862_v51 = vmul.f32 %v861_v50, %v846_v45  ;;  %v913_v59 = vstv %s912_s20  ;;  %v436_v37 = vstv %s435_s10  ;;  %s1621_s20 = sld [smem:[#allocation8 + $0x14]] (%p405_p2) }
 0x2dd   : > { %s924_s19 = sld [smem:[#allocation6 + %s923_s16]]  ;;  %v914_v10 = vmul.f32 %v913_v59, %v910_v55  ;;  %s2001_s10 = scalar_lea.vmem (%p405_p2), %s1560_s9, 32 }
 0x2de   :  { %p2002_p3 = scmp.ne.s32.totalorder (%p405_p2), %s1560_s9, %s2001_s10  ;;  %p2007_p5 = scmp.lt.s32.totalorder (%p405_p2), %s2001_s10, %s2001_s10 }
 0x2e0   : > { %672 = vrot.lane.b32.xlu1 %v670_v13, %s2095_s24  ;;  %660 = vrot.lane.b32.xlu0 %v658_v14, %s2095_s24  ;;  %v936_v13 = vstv %s935_s23  ;;  %v948_v14 = vmul.f32 %v947_v12, %v910_v55  ;;  %s1682_s23 = sld [smem:[#allocation8 + $0x13]] (%p405_p2)  ;;  %p2008_p6 = por (%p405_p2), %p2007_p5, %p2006_p4 }
 0x2e1   : > { %v937_v15 = vmul.f32 %v936_v13, %v910_v55 }
 0x2e2   :  { %p2009_p7 = pnand (%p405_p2), %p2008_p6, %p2002_p3 }
 0x2e3   : > { %v925_v58 = vstv %s924_s19  ;;  %s1622_s19 = sld [smem:[#allocation8 + $0x11]] (%p405_p2) }
 0x2e4   : > { %694 = vrot.lane.b32.xlu1 %v692_v21, %s2095_s24  ;;  %683 = vrot.lane.b32.xlu0 %v681_v22, %s2095_s24  ;;  %s2098_s24 = smov 109   ;;  %v926_v9 = vmul.f32 %v925_v58, %v910_v55 }
 0x2e8   : > { %736 = vrot.lane.b32.xlu1 %v734_v27, %s2096_s11  ;;  %724 = vrot.lane.b32.xlu0 %v722_v28, %s2096_s11 }
 0x2ec   : > { %758 = vrot.lane.b32.xlu1 %v756_v34, %s2096_s11  ;;  %747 = vrot.lane.b32.xlu0 %v745_v35, %s2096_s11  ;;  %v424_v34 = vmul.f32 %v2296_v60, %v2393_v19  ;;  %v431_v35 = vstv %s430_s28  ;;  %s1656_s28 = sld [smem:[#allocation8 + $0x12]] (%p405_p2) }
 0x2ee   : > { %v432_v41 = vmul.f32 %v431_v35, %v424_v34  ;;  %v427_v42 = vmul.f32 %v426_v36, %v424_v34  ;;  %v442_v43 = vmul.f32 %v441_v16, %v424_v34  ;;  %v437_v44 = vmul.f32 %v436_v37, %v424_v34 }
 0x2f0   : > { %800 = vrot.lane.b32.xlu1 %v798_v38, %s2097_s17  ;;  %788 = vrot.lane.b32.xlu0 %v786_v39, %s2097_s17  ;;  %v433_v19 = vadd.f32 %v2065_v7, %v432_v41  ;;  %v438_v53 = vadd.f32 %v2061_v6, %v437_v44 }
 0x2f4   : > { %822 = vrot.lane.b32.xlu1 %v820_v46, %s2097_s17  ;;  %811 = vrot.lane.b32.xlu0 %v809_v47, %s2097_s17 }
 0x2f8   : > { %864 = vrot.lane.b32.xlu1 %v862_v51, %s2098_s24  ;;  %852 = vrot.lane.b32.xlu0 %v850_v52, %s2098_s24  ;;  %v428_v51 = vadd.f32 %v2069_v8, %v427_v42  ;;  %v443_v52 = vadd.f32 %v2057_v5, %v442_v43 }
 0x2fc   : > { %886 = vrot.lane.b32.xlu1 %v884_v56, %s2098_s24  ;;  %875 = vrot.lane.b32.xlu0 %v873_v57, %s2098_s24 }
 0x300   : > { %928 = vrot.lane.b32.xlu1 %v926_v9, %s2099_s25  ;;  %916 = vrot.lane.b32.xlu0 %v914_v10, %s2099_s25 }
 0x304   : > { %950 = vrot.lane.b32.xlu1 %v948_v14, %s2099_s25  ;;  %939 = vrot.lane.b32.xlu0 %v937_v15, %s2099_s25 }
 0x33a   : > { %v481_v17 = vpop.permute.xlu1 %480  ;;  %v469_v18 = vpop.permute.xlu0 %468 }
 0x33b   : > { %v482_v45 = vrot.slane %v481_v17, 2  ;;  %v470_v46 = vrot.slane %v469_v18, 2 }
 0x33d   : > { %v483_v57 = vsel %vm471_vm13, %v481_v17, %v482_v45  ;;  %v472_v58 = vsel %vm471_vm13, %v469_v18, %v470_v46 }
 0x33e   : > { %v503_v11 = vpop.permute.xlu1 %502  ;;  %v492_v20 = vpop.permute.xlu0 %491  ;;  %v485_v18 = vadd.f32 %v483_v57, %v433_v19 }
 0x33f   : > { %v504_v50 = vrot.slane %v503_v11, 2  ;;  %v493_v40 = vrot.slane %v492_v20, 2 }
 0x341   : > { %v505_v9 = vsel %vm471_vm13, %v503_v11, %v504_v50  ;;  %v494_v8 = vsel %vm471_vm13, %v492_v20, %v493_v40  ;;  %v474_v11 = vadd.f32 %v472_v58, %v428_v51 }
 0x342   : > { %v545_v21 = vpop.permute.xlu1 %544  ;;  %v533_v22 = vpop.permute.xlu0 %532  ;;  %v507_v20 = vadd.f32 %v505_v9, %v443_v52  ;;  %v496_v34 = vadd.f32 %v494_v8, %v438_v53 }
 0x343   : > { %v546_v23 = vrot.slane %v545_v21, 2  ;;  %v534_v48 = vrot.slane %v533_v22, 2 }
 0x345   : > { %v547_v6 = vsel %vm535_vm14, %v545_v21, %v546_v23  ;;  %v536_v12 = vsel %vm535_vm14, %v533_v22, %v534_v48 }
 0x346   : > { %v567_v24 = vpop.permute.xlu1 %566  ;;  %v556_v25 = vpop.permute.xlu0 %555  ;;  %v549_v16 = vadd.f32 %v547_v6, %v485_v18  ;;  %v538_v37 = vadd.f32 %v536_v12, %v474_v11 }
 0x347   : > { %v568_v55 = vrot.slane %v567_v24, 2  ;;  %v557_v56 = vrot.slane %v556_v25, 2 }
 0x349   : > { %v569_v13 = vsel %vm535_vm14, %v567_v24, %v568_v55  ;;  %v558_v14 = vsel %vm535_vm14, %v556_v25, %v557_v56 }
 0x34a   : > { %v2504_v26 = vpop.permute.xlu1 %608  ;;  %v2506_v27 = vpop.permute.xlu0 %596  ;;  %v571_v41 = vadd.f32 %v569_v13, %v507_v20  ;;  %v560_v42 = vadd.f32 %v558_v14, %v496_v34 }
 0x34b   : > { %v610_v5 = vrot.slane %v2504_v26, 2  ;;  %v598_v10 = vrot.slane %v2506_v27, 2 }
 0x34d   : > { %v611_v21 = vsel %vm599_vm15, %v2504_v26, %v610_v5  ;;  %v600_v22 = vsel %vm599_vm15, %v2506_v27, %v598_v10 }
 0x34e   : > { %v2510_v28 = vpop.permute.xlu1 %630  ;;  %v2512_v29 = vpop.permute.xlu0 %619  ;;  %v613_v46 = vadd.f32 %v611_v21, %v549_v16  ;;  %v602_v27 = vadd.f32 %v600_v22, %v538_v37 }
 0x34f   : > { %v632_v15 = vrot.slane %v2510_v28, 2  ;;  %v621_v17 = vrot.slane %v2512_v29, 2 }
 0x351   : > { %v633_v43 = vsel %vm599_vm15, %v2510_v28, %v632_v15  ;;  %v622_v44 = vsel %vm599_vm15, %v2512_v29, %v621_v17 }
 0x352   : > { %v2516_v30 = vpop.permute.xlu1 %672  ;;  %v2518_v31 = vpop.permute.xlu0 %660  ;;  %v635_v48 = vadd.f32 %v633_v43, %v571_v41  ;;  %v624_v53 = vadd.f32 %v622_v44, %v560_v42 }
 0x353   : > { %v674_v24 = vrot.slane %v2516_v30, 2  ;;  %v662_v25 = vrot.slane %v2518_v31, 2 }
 0x355   : > { %v675_v52 = vsel %vm663_vm0, %v2516_v30, %v674_v24  ;;  %v664_v28 = vsel %vm663_vm0, %v2518_v31, %v662_v25 }
 0x356   : > { %v2520_v32 = vpop.permute.xlu1 %694  ;;  %v2522_v33 = vpop.permute.xlu0 %683  ;;  %v677_v30 = vadd.f32 %v675_v52, %v613_v46  ;;  %v666_v5 = vadd.f32 %v664_v28, %v602_v27 }
 0x357   : > { %v696_v19 = vrot.slane %v2520_v32, 2  ;;  %v685_v50 = vrot.slane %v2522_v33, 2 }
 0x359   : > { %v697_v31 = vsel %vm663_vm0, %v2520_v32, %v696_v19  ;;  %v686_v10 = vsel %vm663_vm0, %v2522_v33, %v685_v50 }
 0x35a   : > { %v2526_v38 = vpop.permute.xlu1 %736  ;;  %v2528_v39 = vpop.permute.xlu0 %724  ;;  %v699_v21 = vadd.f32 %v697_v31, %v635_v48 }
 0x35b   : > { %v738_v45 = vrot.slane %v2526_v38, 2  ;;  %v726_v26 = vrot.slane %v2528_v39, 2 }
 0x35d   : > { %v739_v57 = vsel %vm727_vm2, %v2526_v38, %v738_v45  ;;  %v728_v58 = vsel %vm727_vm2, %v2528_v39, %v726_v26 }
 0x35e   : > { %v2530_v47 = vpop.permute.xlu1 %758  ;;  %v2532_v49 = vpop.permute.xlu0 %747  ;;  %v741_v17 = vadd.f32 %v739_v57, %v677_v30  ;;  %v730_v39 = vadd.f32 %v728_v58, %v666_v5 }
 0x35f   : > { %v760_v55 = vrot.slane %v2530_v47, 2  ;;  %v749_v56 = vrot.slane %v2532_v49, 2 }
 0x361   : > { %v761_v18 = vsel %vm727_vm2, %v2530_v47, %v760_v55  ;;  %v750_v11 = vsel %vm727_vm2, %v2532_v49, %v749_v56 }
 0x362   : > { %v801_v7 = vpop.permute.xlu1 %800  ;;  %v789_v59 = vpop.permute.xlu0 %788  ;;  %v763_v42 = vadd.f32 %v761_v18, %v699_v21  ;;  %v1938_v18 = vld [vmem:[%s2796_s3 + $0x48] sm:$0xff] (%p405_p2)  }
 0x363   : > { %v802_v29 = vrot.slane %v801_v7, 2  ;;  %v790_v23 = vrot.slane %v789_v59, 2 }
 0x365   : > { %v803_v13 = vsel %vm791_vm4, %v801_v7, %v802_v29  ;;  %v792_v14 = vsel %vm791_vm4, %v789_v59, %v790_v23  ;;  %v688_v7 = vadd.f32 %v686_v10, %v624_v53  ;;  %v1929_v10 = vld [vmem:[%s2796_s3 + $0x28] sm:$0xff] (%p405_p2)  }
 0x366   : > { %v823_v35 = vpop.permute.xlu1 %822  ;;  %v812_v36 = vpop.permute.xlu0 %811  ;;  %v805_v22 = vadd.f32 %v803_v13, %v741_v17  ;;  %v794_v59 = vadd.f32 %v792_v14, %v730_v39  ;;  %1772 = vmatpush3.bf16.msra.mxu1 (%p405_p2), %v1929_v10  ;;  %v1932_v13 = vld [vmem:[%s2796_s3 + $0x60] sm:$0xff] (%p405_p2)   ;;  %v1933_v14 = vld [vmem:[%s2796_s3 + $0x18] sm:$0xff] (%p405_p2)   ;;  %v1936_v17 = vld [vmem:[%s2796_s3 + $0x50] sm:$0xff] (%p405_p2)  }
 0x367   : > { %v824_v38 = vrot.slane %v823_v35, 2  ;;  %v813_v15 = vrot.slane %v812_v36, 2  ;;  %v752_v49 = vadd.f32 %v750_v11, %v688_v7  ;;  %1773 = vmatprep.subr.bf16.mxu1 (%p405_p2), %v2100_v2  ;;  %v1937_v39 = vld [vmem:[%s2796_s3 + $0x8] sm:$0xff] (%p405_p2)   ;;  %v1939_v11 = vld [vmem:[%s2796_s3] sm:$0xff] (%p405_p2)  }
 0x369   : > { %v825_v16 = vsel %vm791_vm4, %v823_v35, %v824_v38  ;;  %v814_v37 = vsel %vm791_vm4, %v812_v36, %v813_v15  ;;  %v1934_v38 = vld [vmem:[%s2796_s3 + $0x58] sm:$0xff] (%p405_p2)   ;;  %v1935_v15 = vld [vmem:[%s2796_s3 + $0x10] sm:$0xff] (%p405_p2)  }
 0x36a   : > { %v865_v40 = vpop.permute.xlu1 %864  ;;  %v853_v51 = vpop.permute.xlu0 %852  ;;  %v827_v19 = vadd.f32 %v825_v16, %v763_v42  ;;  %v816_v50 = vadd.f32 %v814_v37, %v752_v49 }
 0x36b   : > { %v866_v9 = vrot.slane %v865_v40, 2  ;;  %v854_v8 = vrot.slane %v853_v51, 2 }
 0x36d   : > { %v867_v32 = vsel %vm855_vm5, %v865_v40, %v866_v9  ;;  %v856_v33 = vsel %vm855_vm5, %v853_v51, %v854_v8 }
 0x36e   : > { %v887_v6 = vpop.permute.xlu1 %886  ;;  %v876_v12 = vpop.permute.xlu0 %875  ;;  %v869_v43 = vadd.f32 %v867_v32, %v805_v22  ;;  %v858_v44 = vadd.f32 %v856_v33, %v794_v59  ;;  %v1940_v32 = vld [vmem:[%s2796_s3 + $0x40] sm:$0xff] (%p405_p2)  }
 0x36f   : > { %v888_v20 = vrot.slane %v887_v6, 2  ;;  %v877_v34 = vrot.slane %v876_v12, 2 }
 0x371   : > { %v889_v45 = vsel %vm855_vm5, %v887_v6, %v888_v20  ;;  %v878_v26 = vsel %vm855_vm5, %v876_v12, %v877_v34  ;;  %v1931_v12 = vld [vmem:[%s2796_s3 + $0x20] sm:$0xff] (%p405_p2)  }
 0x372   : > { %v929_v24 = vpop.permute.xlu1 %928  ;;  %v917_v25 = vpop.permute.xlu0 %916  ;;  %v891_v29 = vadd.f32 %v889_v45, %v827_v19  ;;  %v880_v23 = vadd.f32 %v878_v26, %v816_v50  ;;  %1774 = vmatpush3.bf16.msra.mxu1 (%p405_p2), %v1931_v12 }
 0x373   : > { %v930_v47 = vrot.slane %v929_v24, 2  ;;  %v918_v41 = vrot.slane %v917_v25, 2  ;;  %1775 = vmatprep.subr.bf16.mxu1 (%p405_p2), %v2100_v2 }
 0x375   : > { %v931_v46 = vsel %vm919_vm6, %v929_v24, %v930_v47  ;;  %v920_v27 = vsel %vm919_vm6, %v917_v25, %v918_v41 }
 0x376   : > { %v2592_v7 = vadd.f32 %v931_v46, %v869_v43   ;;  %v2594_v8 = vadd.f32 %v920_v27, %v858_v44   ;;  %v951_v40 = vpop.permute.xlu1 %950  ;;  %v940_v51 = vpop.permute.xlu0 %939  ;;  %1776 = vmatpush3.bf16.msra.mxu1 (%p405_p2), %v1933_v14 }
 0x377   : > { %v952_v52 = vrot.slane %v951_v40, 2  ;;  %v941_v28 = vrot.slane %v940_v51, 2  ;;  %1777 = vmatprep.subr.bf16.mxu1 (%p405_p2), %v2100_v2 }
 0x378   : > { %v2802_v35 = vmov %v2592_v7  ;;  %v2803_v36 = vmov %v2594_v8 }
 0x379   : > { %v953_v48 = vsel %vm919_vm6, %v951_v40, %v952_v52  ;;  %v942_v53 = vsel %vm919_vm6, %v940_v51, %v941_v28  ;;  %v2808_v7 = vmov %v2802_v35  ;;  %v2809_v8 = vmov %v2803_v36  ;;  %407 = sbr.rel (!%p405_p2) target bundleno = 588 (0x24c), region = 105 }
 0x37a   : > { %v2598_v5 = vadd.f32 %v953_v48, %v891_v29   ;;  %v2600_v6 = vadd.f32 %v942_v53, %v880_v23   ;;  %v1015_v57 = vsel (%p405_p2), %vm382_vm3, %v2802_v35, 0.0  ;;  %v957_v58 = vsel (%p405_p2), %vm382_vm3, %v2803_v36, 0.0  ;;  %1778 = vmatpush3.bf16.msra.mxu1 (%p405_p2), %v1935_v15 }
 0x37b   :  { %v1027_v9 = vmul.f32 (%p405_p2), %v2802_v35, %v2802_v35  ;;  %v970_v8 = vmul.f32 (%p405_p2), %v2803_v36, %v2803_v36  ;;  %1016 = vadd.xlane.f32.xlu1 (%p405_p2), %v1015_v57  ;;  %958 = vadd.xlane.f32.xlu0 (%p405_p2), %v957_v58 }
 0x37c   : > { %v2804_v55 = vmov %v2598_v5  ;;  %v2805_v56 = vmov %v2600_v6  ;;  %1779 = vmatprep.subr.bf16.mxu1 (%p405_p2), %v2100_v2 }
 0x37d   : > { %v2806_v5 = vmov %v2804_v55  ;;  %v2807_v6 = vmov %v2805_v56  ;;  %v1249_v30 = vsel (%p405_p2), %vm382_vm3, %v2805_v56, 0.0  ;;  %v1261_v31 = vmul.f32 (%p405_p2), %v2805_v56, %v2805_v56 }
 0x37e   :  { %v1396_v54 = vsel %vm382_vm3, %v2804_v55, 0.0  ;;  %v1408_v60 = vmul.f32 %v2804_v55, %v2804_v55  ;;  %v1028_v61 = vsel %vm382_vm3, %v1027_v9, 0.0  ;;  %v971_v62 = vsel %vm382_vm3, %v970_v8, 0.0  ;;  %v1928_v5 = vld [vmem:[%s2796_s3 + $0x70] sm:$0xff]   ;;  %v1930_v6 = vld [vmem:[%s2796_s3 + $0x68] sm:$0xff]   ;;  %1780 = vmatpush3.bf16.msra.mxu1 %v1937_v39 }
 0x37f   :  { %v1262_v63 = vsel %vm382_vm3, %v1261_v31, 0.0  ;;  %1029 = vadd.xlane.f32.xlu1 %v1028_v61  ;;  %972 = vadd.xlane.f32.xlu0 %v971_v62 }
 0x380   :  { %v1409_v0 = vsel %vm382_vm3, %v1408_v60, 0.0  ;;  %1750 = vmatpush3.bf16.msra.mxu0 %v1928_v5  ;;  %1781 = vmatprep.subr.bf16.mxu1 %v2100_v2  ;;  %vm1551_vm3 = vcmask 123904  }
 0x381   :  { %1751 = vmatprep.subr.bf16.mxu0 %v2100_v2 }
 0x382   :  { %1782 = vmatpush3.bf16.msra.mxu1 %v1939_v11 }
 0x383   :  { %1250 = vadd.xlane.f32.xlu0 %v1249_v30  ;;  %1263 = vadd.xlane.f32.xlu1 %v1262_v63 }
 0x384   :  { %1752 = vmatpush3.bf16.msra.mxu0 %v1930_v6  ;;  %1807 = vmatprep.subr.bf16.mxu1 %v2100_v2 }
 0x385   :  { %1753 = vmatprep.subr.bf16.mxu0 %v2100_v2 }
 0x387   :  { %1397 = vadd.xlane.f32.xlu0 %v1396_v54  ;;  %1410 = vadd.xlane.f32.xlu1 %v1409_v0 }
 0x388   :  { %1754 = vmatpush3.bf16.msra.mxu0 %v1932_v13 }
 0x389   :  { %1755 = vmatprep.subr.bf16.mxu0 %v2100_v2 }
 0x38c   :  { %1756 = vmatpush3.bf16.msra.mxu0 %v1934_v38 }
 0x38d   :  { %1757 = vmatprep.subr.bf16.mxu0 %v2100_v2 }
 0x390   :  { %1758 = vmatpush3.bf16.msra.mxu0 %v1936_v17 }
 0x391   :  { %1759 = vmatprep.subr.bf16.mxu0 %v2100_v2 }
 0x394   :  { %1760 = vmatpush3.bf16.msra.mxu0 %v1938_v18 }
 0x395   :  { %1761 = vmatprep.subr.bf16.mxu0 %v2100_v2 }
 0x398   :  { %1762 = vmatpush3.bf16.msra.mxu0 %v1940_v32 }
 0x399   :  { %1787 = vmatprep.subr.bf16.mxu0 %v2100_v2 }
 0x404   :  { %v1017_v33 = vpop.xlane.xlu1 %1016  ;;  %v959_v20 = vpop.xlane.xlu0 %958 }
 0x405   :  { %v1018_v34 = vrot.slane %v1017_v33, 4  ;;  %v960_v21 = vrot.slane %v959_v20, 4 }
 0x407   :  { %v1019_v7 = vadd.f32 %v1018_v34, %v1017_v33  ;;  %v961_v22 = vadd.f32 %v960_v21, %v959_v20 }
 0x408   :  { %v1030_v59 = vpop.xlane.xlu1 %1029  ;;  %v973_v24 = vpop.xlane.xlu0 %972 }
 0x409   :  { %v1020_v25 = vrot.slane %v1019_v7, 2  ;;  %v962_v16 = vrot.slane %v961_v22, 2  ;;  %v1031_v37 = vrot.slane %v1030_v59, 4  ;;  %v974_v47 = vrot.slane %v973_v24, 4 }
 0x40b   :  { %v1032_v41 = vadd.f32 %v1031_v37, %v1030_v59  ;;  %v975_v42 = vadd.f32 %v974_v47, %v973_v24  ;;  %v963_v49 = vadd.f32 %v962_v16, %v961_v22  ;;  %v1021_v45 = vadd.f32 %v1020_v25, %v1019_v7 }
 0x40c   :  { %v1251_v43 = vpop.xlane.xlu0 %1250  ;;  %v1264_v44 = vpop.xlane.xlu1 %1263 }
 0x40d   :  { %v1033_v26 = vrot.slane %v1032_v41, 2  ;;  %v976_v46 = vrot.slane %v975_v42, 2  ;;  %v1252_v27 = vrot.slane %v1251_v43, 4  ;;  %v1265_v19 = vrot.slane %v1264_v44, 4 }
 0x40e   :  { %v964_v50 = vrot.slane %v963_v49, 1  ;;  %v1022_v53 = vrot.slane %v1021_v45, 1 }
 0x40f   :  { %v1253_v40 = vadd.f32 %v1252_v27, %v1251_v43  ;;  %v1266_v51 = vadd.f32 %v1265_v19, %v1264_v44  ;;  %v977_v52 = vadd.f32 %v976_v46, %v975_v42  ;;  %v1034_v28 = vadd.f32 %v1033_v26, %v1032_v41 }
 0x410   :  { %v1398_v29 = vpop.xlane.xlu0 %1397  ;;  %v965_v23 = vadd.f32 %v964_v50, %v963_v49  ;;  %v1411_v48 = vpop.xlane.xlu1 %1410  ;;  %v1023_v0 = vadd.f32 %v1022_v53, %v1021_v45 }
 0x411   :  { %v1254_v57 = vrot.slane %v1253_v40, 2  ;;  %v1267_v58 = vrot.slane %v1266_v51, 2  ;;  %v1399_v9 = vrot.slane %v1398_v29, 4  ;;  %v1412_v8 = vrot.slane %v1411_v48, 4 }
 0x412   :  { %1831 = vpush %v965_v23  ;;  %v978_v30 = vrot.slane %v977_v52, 1  ;;  %v1035_v31 = vrot.slane %v1034_v28, 1 }
 0x413   :  { %v1400_v54 = vadd.f32 %v1399_v9, %v1398_v29  ;;  %v1413_v60 = vadd.f32 %v1412_v8, %v1411_v48  ;;  %v1255_v61 = vadd.f32 %v1254_v57, %v1253_v40  ;;  %v1268_v62 = vadd.f32 %v1267_v58, %v1266_v51 }
 0x414   :  { %v979_v63 = vadd.f32 %v978_v30, %v977_v52  ;;  %v1036_v1 = vadd.f32 %v1035_v31, %v1034_v28  ;;  %v989_v52 = vstv %s1620_s18  ;;  %v1046_v48 = vstv %s1622_s19 }
 0x415   :  { %v1401_v3 = vrot.slane %v1400_v54, 2  ;;  %v1414_v4 = vrot.slane %v1413_v60, 2  ;;  %v1256_v5 = vrot.slane %v1255_v61, 1  ;;  %v1269_v10 = vrot.slane %v1268_v62, 1 }
 0x416   :  { %1833 = vpush %v979_v63  ;;  %v993_v57 = vstv %s1621_s20 }
 0x417   :  { %v1402_v6 = vadd.f32 %v1401_v3, %v1400_v54  ;;  %v1415_v12 = vadd.f32 %v1414_v4, %v1413_v60  ;;  %1835 = vpush %v1023_v0  ;;  %v1257_v13 = vadd.f32 %v1256_v5, %v1255_v61  ;;  %v1270_v14 = vadd.f32 %v1269_v10, %v1268_v62  ;;  %v1941_v4 = vld [vmem:[%s2796_s3 + $0xf8] sm:$0xff]  }
 0x418   :  { %1837 = vpush %v1036_v1  ;;  %v1050_v60 = vstv %s1623_s7 }
 0x419   :  { %1839 = vpush %v1257_v13  ;;  %v1403_v38 = vrot.slane %v1402_v6, 1  ;;  %v1416_v15 = vrot.slane %v1415_v12, 1  ;;  %v1944_v13 = vld [vmem:[%s2796_s3 + $0xb0] sm:$0xff]  }
 0x41a   :  { %1841 = vpush %v1270_v14  ;;  %v1945_v14 = vld [vmem:[%s2796_s3 + $0xe8] sm:$0xff]  }
 0x41b   :  { %v1404_v17 = vadd.f32 %v1403_v38, %v1402_v6  ;;  %v1417_v39 = vadd.f32 %v1416_v15, %v1415_v12  ;;  %v1427_v15 = vstv %s1682_s23 }
 0x41d   :  { %1843 = vpush %v1404_v17  ;;  %v1946_v17 = vld [vmem:[%s2796_s3 + $0xa8] sm:$0xff]  }
 0x41e   :  { %1845 = vpush %v1417_v39  ;;  %v1947_v39 = vld [vmem:[%s2796_s3 + $0xe0] sm:$0xff]  }
 0x443   :  { %s1832_s13 = spop %1831 }
 0x444   :  { %v967_v18 = vstv %s1832_s13 }
 0x445   :  { %v969_v11 = vmul.f32 0.0078125, %v967_v18 }
 0x447   :  { %s1834_s14 = spop %1833  ;;  %v983_v33 = vmul.f32 %v969_v11, %v969_v11 }
 0x448   :  { %v981_v32 = vstv %s1834_s14  ;;  %s1836_s6 = spop %1835  ;;  %s1657_s14 = sld [smem:[#allocation8 + $0x16]] }
 0x449   :  { %v982_v20 = vmul.f32 0.0078125, %v981_v32  ;;  %v1025_v34 = vstv %s1836_s6  ;;  %s1838_s1 = spop %1837  ;;  %v1280_v32 = vstv %s1656_s28 }
 0x44a   :  { %v1026_v21 = vmul.f32 0.0078125, %v1025_v34  ;;  %v1038_v7 = vstv %s1838_s1  ;;  %s1840_s5 = spop %1839 }
 0x44b   :  { %v984_v22 = vsub.f32 %v982_v20, %v983_v33  ;;  %v1039_v24 = vmul.f32 0.0078125, %v1038_v7  ;;  %s1842_s15 = spop %1841  ;;  %v1259_v42 = vstv %s1840_s5  ;;  %v1948_v33 = vld [vmem:[%s2796_s3 + $0xa0] sm:$0xff]   ;;  %v1949_v20 = vld [vmem:[%s2796_s3 + $0xd8] sm:$0xff]   ;;  %v1431_v7 = vstv %s1683_s22 }
 0x44c   :  { %v1040_v59 = vmul.f32 %v1026_v21, %v1026_v21  ;;  %v2709_v45 = vmul.f32 0.0078125, %v1259_v42  ;;  %v1272_v26 = vstv %s1842_s15 }
 0x44d   :  { %v985_v25 = vmax.f32 %v984_v22, 0.0  ;;  %v1273_v50 = vmul.f32 0.0078125, %v1272_v26  ;;  %v1950_v22 = vld [vmem:[%s2796_s3 + $0x98] sm:$0xff]  }
 0x44e   :  { %v1041_v16 = vsub.f32 %v1039_v24, %v1040_v59  ;;  %s1844_s16 = spop %1843  ;;  %v1274_v19 = vmul.f32 %v2709_v45, %v2709_v45  ;;  %v1951_v59 = vld [vmem:[%s2796_s3 + $0xd0] sm:$0xff]  }
 0x44f   :  { %v987_v37 = vadd.f32 1e-05, %v985_v25  ;;  %v1406_v47 = vstv %s1844_s16  ;;  %s1846_s17 = spop %1845 }
 0x450   :  { %v1042_v41 = vmax.f32 %v1041_v16, 0.0  ;;  %v2707_v49 = vmul.f32 0.0078125, %v1406_v47  ;;  %v1419_v44 = vstv %s1846_s17  ;;  %v1275_v51 = vsub.f32 %v1273_v50, %v1274_v19  ;;  %v1952_v47 = vld [vmem:[%s2796_s3 + $0x90] sm:$0xff]  }
 0x451   :  { %1957 = vrsqrt.f32 %v987_v37  ;;  %v1420_v27 = vmul.f32 0.0078125, %v1419_v44  ;;  %v1284_v37 = vstv %s1657_s14  ;;  %v1955_v44 = vld [vmem:[%s2796_s3 + $0xc0] sm:$0xff]  }
 0x452   :  { %v1044_v43 = vadd.f32 1e-05, %v1042_v41  ;;  %v1421_v46 = vmul.f32 %v2707_v49, %v2707_v49  ;;  %v1276_v53 = vmax.f32 %v1275_v51, 0.0  ;;  %v1953_v41 = vld [vmem:[%s2796_s3 + $0xc8] sm:$0xff]  }
 0x454   :  { %1959 = vrsqrt.f32 %v1044_v43  ;;  %v1422_v40 = vsub.f32 %v1420_v27, %v1421_v46  ;;  %v1278_v61 = vadd.f32 1e-05, %v1276_v53 }
 0x456   :  { %v1423_v28 = vmax.f32 %v1422_v40, 0.0 }
 0x458   :  { %v1425_v9 = vadd.f32 1e-05, %v1423_v28 }
 0x45a   :  { %1961 = vrsqrt.f32 %v1425_v9 }
 0x45b   :  { %1963 = vrsqrt.f32 %v1278_v61 }
 0x45e   :  { %v1958_v29 = vpop.eup %1957 }
 0x45f   :  { %v990_v23 = vmul.f32 %v1958_v29, %v989_v52 }
 0x461   :  { %v1960_v58 = vpop.eup %1959  ;;  %v992_v8 = vmul.f32 %v990_v23, %v969_v11  ;;  %v995_v54 = vmul.f32 %v990_v23, %v2803_v36  ;;  %v1942_v36 = vld [vmem:[%s2796_s3 + $0xb8] sm:$0xff]  }
 0x462   :  { %v1047_v30 = vmul.f32 %v1960_v58, %v1046_v48 }
 0x463   :  { %v994_v31 = vsub.f32 %v993_v57, %v992_v8 }
 0x464   :  { %v1049_v62 = vmul.f32 %v1047_v30, %v1026_v21  ;;  %v1052_v1 = vmul.f32 %v1047_v30, %v2802_v35  ;;  %v1943_v35 = vld [vmem:[%s2796_s3 + $0xf0] sm:$0xff]  }
 0x465   :  { %v996_v63 = vadd.f32 %v995_v54, %v994_v31  ;;  %v1708_v31 = vld [vmem:[%s2797_s4] ss:$0 sm:$0xff] }
 0x466   :  { %v1051_v0 = vsub.f32 %v1050_v60, %v1049_v62 }
 0x467   :  { %v997_v3 = vmax.f32 %v996_v63, 0.0  ;;  %v1962_v38 = vpop.eup %1961 }
 0x468   :  { %v1053_v5 = vadd.f32 %v1052_v1, %v1051_v0  ;;  %v1964_v18 = vpop.eup %1963  ;;  %v1428_v11 = vmul.f32 %v1962_v38, %v1427_v15 }
 0x469   :  { %v998_v10 = vpack.c.bf16 %v997_v3, %v997_v3  ;;  %v1281_v34 = vmul.f32 %v1964_v18, %v1280_v32 }
 0x46a   :  { %v1054_v6 = vmax.f32 %v1053_v5, 0.0  ;;  %v1430_v21 = vmul.f32 %v1428_v11, %v2707_v49  ;;  %v1433_v16 = vmul.f32 %v1428_v11, %v2804_v55  ;;  %v1954_v55 = vld [vmem:[%s2796_s3 + $0x88] sm:$0xff]  }
 0x46b   :  { %1784 = vmatmul.mubr.bf16.vlgmr.msra.gmra.mxu1 %v998_v10  ;;  %v1283_v24 = vmul.f32 %v1281_v34, %v2709_v45  ;;  %v1286_v49 = vmul.f32 %v1281_v34, %v2805_v56  ;;  %v1956_v56 = vld [vmem:[%s2796_s3 + $0x80] sm:$0xff]  }
 0x46c   :  { %1808 = vmatpush3.bf16.msra.mxu1 %v1941_v4  ;;  %v1055_v12 = vpack.c.bf16 %v1054_v6, %v1054_v6  ;;  %1823 = vmatprep.mubr.msk.bf16.mxu1 %vm2101_vm1, %v2100_v2  ;;  %v1432_v25 = vsub.f32 %v1431_v7, %v1430_v21 }
 0x46d   :  { %1809 = vmatprep.subr.bf16.mxu1 %v2100_v2  ;;  %v1285_v42 = vsub.f32 %v1284_v37, %v1283_v24 }
 0x46e   :  { %1764 = vmatmul.mubr.bf16.vlgmr.msra.gmra.mxu0 %v1055_v12  ;;  %v1434_v43 = vadd.f32 %v1433_v16, %v1432_v25 }
 0x46f   :  { %1788 = vmatpush3.bf16.msra.mxu0 %v1942_v36  ;;  %1803 = vmatprep.mubr.msk.bf16.mxu0 %vm2101_vm1, %v2100_v2  ;;  %v1287_v45 = vadd.f32 %v1286_v49, %v1285_v42 }
 0x470   :  { %1810 = vmatpush3.bf16.msra.mxu1 %v1943_v35  ;;  %1789 = vmatprep.subr.bf16.mxu0 %v2100_v2  ;;  %v1435_v26 = vmax.f32 %v1434_v43, 0.0 }
 0x471   :  { %1811 = vmatprep.subr.bf16.mxu1 %v2100_v2  ;;  %v1288_v46 = vmax.f32 %v1287_v45, 0.0 }
 0x472   :  { %v1436_v27 = vpack.c.bf16 %v1435_v26, %v1435_v26 }
 0x473   :  { %1790 = vmatpush3.bf16.msra.mxu0 %v1944_v13  ;;  %v1289_v19 = vpack.c.bf16 %v1288_v46, %v1288_v46 }
 0x474   :  { %1812 = vmatpush3.bf16.msra.mxu1 %v1945_v14  ;;  %1791 = vmatprep.subr.bf16.mxu0 %v2100_v2 }
 0x475   :  { %1813 = vmatprep.subr.bf16.mxu1 %v2100_v2 }
 0x477   :  { %1792 = vmatpush3.bf16.msra.mxu0 %v1946_v17 }
 0x478   :  { %1814 = vmatpush3.bf16.msra.mxu1 %v1947_v39  ;;  %1793 = vmatprep.subr.bf16.mxu0 %v2100_v2 }
 0x479   :  { %1815 = vmatprep.subr.bf16.mxu1 %v2100_v2 }
 0x47b   :  { %1794 = vmatpush3.bf16.msra.mxu0 %v1948_v33 }
 0x47c   :  { %1816 = vmatpush3.bf16.msra.mxu1 %v1949_v20  ;;  %1795 = vmatprep.subr.bf16.mxu0 %v2100_v2 }
 0x47d   :  { %1817 = vmatprep.subr.bf16.mxu1 %v2100_v2 }
 0x47f   :  { %1796 = vmatpush3.bf16.msra.mxu0 %v1950_v22 }
 0x480   :  { %1818 = vmatpush3.bf16.msra.mxu1 %v1951_v59  ;;  %1797 = vmatprep.subr.bf16.mxu0 %v2100_v2 }
 0x481   :  { %1819 = vmatprep.subr.bf16.mxu1 %v2100_v2 }
 0x483   :  { %1798 = vmatpush3.bf16.msra.mxu0 %v1952_v47 }
 0x484   :  { %1820 = vmatpush3.bf16.msra.mxu1 %v1953_v41  ;;  %1799 = vmatprep.subr.bf16.mxu0 %v2100_v2 }
 0x485   :  { %1821 = vmatprep.subr.bf16.mxu1 %v2100_v2 }
 0x487   :  { %1800 = vmatpush3.bf16.msra.mxu0 %v1954_v55 }
 0x488   :  { %1822 = vmatpush3.bf16.msra.mxu1 %v1955_v44  ;;  %1801 = vmatprep.subr.bf16.mxu0 %v2100_v2 }
 0x48b   :  { %1802 = vmatpush3.bf16.msra.mxu0 %v1956_v56  ;;  %1824 = vmatmul.mubr.bf16.vlgmr.msra.gmra.mxu1 %v1436_v27 }
 0x48e   :  { %1804 = vmatmul.mubr.bf16.vlgmr.msra.gmra.mxu0 %v1289_v19 }
 0x52b   :  { %v1243_v50 = vpop.f32.mrf.mxu1 }
 0x52d   :  { %v1785_v40 = vpop.f32.mrf.mxu1 }
 0x52e   :  { %v1155_v51 = vpop.f32.mrf.mxu0 }
 0x52f   :  { %v1246_v52 = vpop.f32.mrf.mxu1  ;;  %v1244_v57 = vadd.f32 %v1243_v50, %v1155_v51 }
 0x530   :  { %v1765_v28 = vpop.f32.mrf.mxu0 }
 0x531   :  { %v1786_v29 = vpop.f32.mrf.mxu1 }
 0x532   :  { %v1158_v23 = vpop.f32.mrf.mxu0 }
 0x534   :  { %v1766_v48 = vpop.f32.mrf.mxu0 }
 0x54b   :  { %v1536_v53 = vpop.f32.mrf.mxu1 }
 0x54d   :  { %v1825_v58 = vpop.f32.mrf.mxu1 }
 0x54e   :  { %v1389_v9 = vpop.f32.mrf.mxu0 }
 0x54f   :  { %v1395_v8 = vadd.f32 %v1389_v9, %v1244_v57  ;;  %v1539_v2 = vpop.f32.mrf.mxu1 }
 0x550   :  { %v1805_v30 = vpop.f32.mrf.mxu0 }
 0x551   :  { %v1542_v54 = vadd.f32 %v1536_v53, %v1395_v8  ;;  %v1826_v60 = vpop.f32.mrf.mxu1 }
 0x552   :  { %v1392_v61 = vpop.f32.mrf.mxu0 }
 0x553   :  { %v1550_v62 = vadd.f32 %v1708_v31, %v1542_v54 }
 0x554   :  { %v1806_v63 = vpop.f32.mrf.mxu0 }
 0x555   :  { %1552 = vst.msk [vmem:[#allocation9] sm:$0x3] %vm1551_vm3, %v1550_v62 }
 0x556   :  { %2012 = shalt.err (!%p2009_p7)
}
 0x557   :  { %1562 = dma.vmem_to_hbm [thread:$0]  %s1560_s9, 32, %s2801_s8, [#allocation4]  }
 0x558   :  { %2049 = dma.done.wait [#allocation4], 32  }
 0x559   :  { %2050 = vsyncadd [#allocation4], 4294967264 }
 0x55a   :  { %1566 = vsyncpa [#allocation4], 1 }
 0x55b   :  { %1567 = vsyncpa [#allocation5], 1 }
 0x55c   :  { %1568 = vsyncpa [#allocation7], 1 }

</bundles_post_ra>
